<compile_context>
chip_gen: v5e
topology: v5e:2x2
jax: 0.10.0
libtpu: 0.0.40
codegen_flags: <defaults>
</compile_context>

<pallas_src>
from functools import partial

import jax
import jax.numpy as jnp
from jax.experimental import pallas as pl
from jax.experimental.pallas import tpu as pltpu

EPS = 1e-5
_SQRT1_2 = 0.7071067811865476


def _erf_approx(x):
    # Abramowitz & Stegun 7.1.26 (max abs err ~1.5e-7); exp/mul/add/div only.
    # (pl.reciprocal(..., approx=True) could push the divide to the EUP slot if the
    #  kernel ever became VALU-bound; kept as an exact divide for accuracy.)
    a1, a2, a3 = 0.254829592, -0.284496736, 1.421413741
    a4, a5, p = -1.453152027, 1.061405429, 0.3275911
    sign = jnp.where(x >= 0.0, 1.0, -1.0).astype(x.dtype)
    ax = jnp.abs(x)
    t = 1.0 / (1.0 + p * ax)
    poly = ((((a5 * t + a4) * t + a3) * t + a2) * t + a1) * t
    return sign * (1.0 - poly * jnp.exp(-ax * ax))


def _gelu_exact(x):
    # nn.GELU() default (erf-based), not the tanh approximation.
    return 0.5 * x * (1.0 + _erf_approx(x * _SQRT1_2))


def _convblock_kernel(H, W, x_ref, wcol_ref, wcg_ref, bcg_ref, wl_ref, bl_ref,
                      o_ref, col_ref):
    # x_ref:    (Cin, HW)        one image, channels-major, flat spatial (lane dense)
    # wcol_ref: (1, HW) int32    w-coordinate (s mod W) of every flat position
    # wcg_ref:  (2*Cout, 9*Cin)  fused [conv; gate] 3x3 weights, tap-major columns
    # bcg_ref:  (2*Cout, 1) f32  fused [conv; gate] biases
    # wl_ref:   (Cout, Cout)     1x1 "linear" weight
    # bl_ref:   (Cout, 1) f32
    # o_ref:    (Cout, HW)
    # col_ref:  (9*Cin, HW)      im2col scratch (kept in the input dtype)
    Cin, HW = x_ref.shape
    Cout = o_ref.shape[0]

    x = x_ref[...]
    ww = wcol_ref[...]
    zero = jnp.zeros((), x.dtype)

    # Pre-masked copies of x for the three horizontal tap offsets ox = dx - 1.
    # They zero the source columns whose shifted copy would bleed across a row
    # boundary (this implements the left/right zero padding).
    xm = {
        -1: jnp.where(ww != W - 1, x, zero),   # taps with ox = -1
        0: x,                                  # taps with ox =  0
        1: jnp.where(ww != 0, x, zero),        # taps with ox = +1
    }

    # im2col: col[t*Cin + c, s] = x[c, (h+dy-1, w+dx-1)] or 0 outside the image.
    # Built with contiguous, static shifted slice-stores -- no strided gathers, no
    # per-tap accumulator read-modify-writes.
    col_ref[...] = jnp.zeros_like(col_ref)     # top/bottom halo positions stay zero
    for dy in range(3):
        for dx in range(3):
            t = dy * 3 + dx
            off = (dy - 1) * W + (dx - 1)      # flat-index shift of this tap
            src = xm[dx - 1]
            d0 = max(0, -off)
            s0 = max(0, off)
            length = HW - abs(off)
            col_ref[t * Cin:(t + 1) * Cin, d0:d0 + length] = src[:, s0:s0 + length]

    # conv + gate branches in a single MXU matmul (K = 9*Cin), f32 accumulation.
    z = jnp.dot(wcg_ref[...], col_ref[...], preferred_element_type=jnp.float32)
    z = z + bcg_ref[...]
    x1 = z[:Cout, :]
    x2 = z[Cout:, :]
    prod = x1 * _gelu_exact(x2)

    # InstanceNorm2d (affine=False): per-channel stats over HW (lane reduction),
    # two-pass (centered) variance for numerical robustness.
    mean = jnp.mean(prod, axis=1, keepdims=True)                 # (Cout, 1)
    centered = prod - mean
    var = jnp.mean(centered * centered, axis=1, keepdims=True)
    scaled = centered * jax.lax.rsqrt(var + EPS)                 # == normed

    # 1x1 conv ("linear") + bias + identity residual; HW stays on the lanes so the
    # final store is unmasked / lane-dense.
    y = jnp.dot(wl_ref[...], scaled, preferred_element_type=jnp.float32)
    y = y + bl_ref[...] + x.astype(jnp.float32)
    o_ref[...] = y.astype(o_ref.dtype)


def convblock_forward(x, w_conv, b_conv, w_gate, b_gate, w_lin, b_lin):
    """Convblock forward with module defaults (Identity projection, k=3, pad=1, stride=1).

    x:      (B, Cin, H, W)  NCHW, like PyTorch
    w_conv: (Cout, Cin, 3, 3)   b_conv: (Cout,)
    w_gate: (Cout, Cin, 3, 3)   b_gate: (Cout,)
    w_lin:  (Cout, Cout, 1, 1)  b_lin:  (Cout,)
    returns (B, Cout, H, W), same dtype as x.
    """
    B, Cin, H, W = x.shape
    Cout = w_conv.shape[0]
    assert Cout == Cin, "only the Identity-projection path (out_ch == in_ch) is implemented"
    # TODO(synk): out_ch != in_ch (1x1 projection conv) and stride != 1 paths not implemented.
    # TODO(synk): for B == 1 on v7x, add a spatial 'parallel' grid axis + two-phase
    #             InstanceNorm so both TensorCores get work.
    HW = H * W

    # Metadata-only reshape; no pad / transpose HBM round trips on the activations.
    x_flat = x.reshape(B, Cin, HW)

    # (Cout, Cin, 3, 3) -> (2*Cout, 9*Cin): rows = [conv; gate], columns tap-major
    # (dy, dx, cin) to match the im2col row order.  Kept in the original dtype so a
    # bf16 model would feed the MXU at full rate.
    wc = jnp.transpose(w_conv, (0, 2, 3, 1)).reshape(Cout, 9 * Cin)
    wg = jnp.transpose(w_gate, (0, 2, 3, 1)).reshape(Cout, 9 * Cin)
    wcg = jnp.concatenate([wc, wg], axis=0)
    bcg = jnp.concatenate([b_conv, b_gate]).reshape(2 * Cout, 1).astype(jnp.float32)
    wl = w_lin.reshape(Cout, Cout)
    bl = b_lin.reshape(Cout, 1).astype(jnp.float32)

    # w-coordinate of each flat spatial position (used for the in-kernel halo masks).
    wcol = (jnp.arange(HW, dtype=jnp.int32) % W).reshape(1, HW)

    # VMEM budget: double-buffered blocks + weights + im2col scratch + f32 temps,
    # capped at 85% of the physical VMEM of the local chip generation.
    isz = x.dtype.itemsize
    est = (2 * Cin * HW * isz                 # input block (double-buffered)
           + 2 * Cout * HW * isz              # output block (double-buffered)
           + 2 * wcg.size * wcg.dtype.itemsize
           + 2 * wl.size * wl.dtype.itemsize
           + 9 * Cin * HW * isz               # im2col scratch
           + 10 * Cout * HW * 4               # f32 temporaries (z / prod / centered / y)
           + 8 * HW * 4)
    try:
        phys = pltpu.get_tpu_info().vmem_capacity_bytes
    except Exception:
        phys = 64 * 2**20
    vmem_limit = int(min(max(2 * est, 32 * 2**20), int(phys * 0.85)))

    out_flat = pl.pallas_call(
        partial(_convblock_kernel, H, W),
        out_shape=jax.ShapeDtypeStruct((B, Cout, HW), x.dtype),
        grid_spec=pltpu.PrefetchScalarGridSpec(
            num_scalar_prefetch=0,
            grid=(B,),
            in_specs=[
                pl.BlockSpec((None, Cin, HW), lambda b: (b, 0, 0)),
                pl.BlockSpec((1, HW), lambda b: (0, 0)),
                pl.BlockSpec((2 * Cout, 9 * Cin), lambda b: (0, 0)),
                pl.BlockSpec((2 * Cout, 1), lambda b: (0, 0)),
                pl.BlockSpec((Cout, Cout), lambda b: (0, 0)),
                pl.BlockSpec((Cout, 1), lambda b: (0, 0)),
            ],
            out_specs=pl.BlockSpec((None, Cout, HW), lambda b: (b, 0, 0)),
            scratch_shapes=[pltpu.VMEM((9 * Cin, HW), x.dtype)],
        ),
        compiler_params=pltpu.CompilerParams(
            dimension_semantics=("parallel",),
            vmem_limit_bytes=vmem_limit,
        ),
    )(x_flat, wcol, wcg, bcg, wl, bl)

    # Metadata-only reshape back to NCHW.
    return out_flat.reshape(B, Cout, H, W)


if __name__ == "__main__":
    key = jax.random.PRNGKey(0)
    B, C, H, W = 2, 32, 16, 16          # in_ch == out_ch -> Identity projection
    ks = jax.random.split(key, 7)
    x = jax.random.normal(ks[0], (B, C, H, W), dtype=jnp.float32)

    fan3 = 1.0 / (9 * C) ** 0.5
    fan1 = 1.0 / C ** 0.5
    w_conv = jax.random.normal(ks[1], (C, C, 3, 3), jnp.float32) * fan3
    b_conv = jax.random.normal(ks[2], (C,), jnp.float32) * 0.1
    w_gate = jax.random.normal(ks[3], (C, C, 3, 3), jnp.float32) * fan3
    b_gate = jax.random.normal(ks[4], (C,), jnp.float32) * 0.1
    w_lin = jax.random.normal(ks[5], (C, C, 1, 1), jnp.float32) * fan1
    b_lin = jax.random.normal(ks[6], (C,), jnp.float32) * 0.1

    out = convblock_forward(x, w_conv, b_conv, w_gate, b_gate, w_lin, b_lin)
    out = jax.block_until_ready(out)

    # Pure-JAX reference (matches the PyTorch forward).
    def ref(x):
        dn = jax.lax.conv_dimension_numbers(x.shape, w_conv.shape, ('NCHW', 'OIHW', 'NCHW'))
        conv = lambda inp, w: jax.lax.conv_general_dilated(
            inp, w, (1, 1), ((1, 1), (1, 1)), dimension_numbers=dn,
            precision=jax.lax.Precision.HIGHEST)
        x1 = conv(x, w_conv) + b_conv[None, :, None, None]
        x2 = jax.nn.gelu(conv(x, w_gate) + b_gate[None, :, None, None], approximate=False)
        prod = x1 * x2
        mu = prod.mean(axis=(2, 3), keepdims=True)
        var = prod.var(axis=(2, 3), keepdims=True)            # biased (ddof=0)
        nrm = (prod - mu) / jnp.sqrt(var + EPS)
        lin = jnp.einsum('oi,bihw->bohw', w_lin[:, :, 0, 0], nrm,
                         precision=jax.lax.Precision.HIGHEST) + b_lin[None, :, None, None]
        return lin + x                                        # Identity projection residual

    r = ref(x)
    assert out.shape == x.shape and out.dtype == x.dtype
    err = float(jnp.max(jnp.abs(out - r)))
    assert jnp.allclose(out, r, atol=5e-3, rtol=5e-3), f"max abs err {err}"
    print("KERNEL_OK")
</pallas_src>

<mosaic_0001>
module attributes {stable_mosaic.version = 11 : i64} {
  func.func @_convblock_kernel(%arg0: i32, %arg1: memref<1x32x256xf32, #tpu.memory_space<vmem>>, %arg2: memref<1x256xi32, #tpu.memory_space<vmem>>, %arg3: memref<64x288xf32, #tpu.memory_space<vmem>>, %arg4: memref<64x1xf32, #tpu.memory_space<vmem>>, %arg5: memref<32x32xf32, #tpu.memory_space<vmem>>, %arg6: memref<32x1xf32, #tpu.memory_space<vmem>>, %arg7: memref<1x32x256xf32, #tpu.memory_space<vmem>>, %arg8: memref<288x256xf32, #tpu.memory_space<vmem>>) attributes {dimension_semantics = [#tpu.dimension_semantics<parallel>], iteration_bounds = array<i64: 2>, scalar_prefetch = 0 : i64, scratch_operands = 1 : i64, tpu.core_type = #tpu.core_type<tc>, window_params = [{transform_indices = @transform_0, window_bounds = array<i64: 1, 32, 256>}, {pipeline_mode = #tpu.pipeline_mode<synchronous>, transform_indices = @transform_1, window_bounds = array<i64: 1, 256>}, {pipeline_mode = #tpu.pipeline_mode<synchronous>, transform_indices = @transform_2, window_bounds = array<i64: 64, 288>}, {pipeline_mode = #tpu.pipeline_mode<synchronous>, transform_indices = @transform_3, window_bounds = array<i64: 64, 1>}, {pipeline_mode = #tpu.pipeline_mode<synchronous>, transform_indices = @transform_4, window_bounds = array<i64: 32, 32>}, {pipeline_mode = #tpu.pipeline_mode<synchronous>, transform_indices = @transform_5, window_bounds = array<i64: 32, 1>}, {transform_indices = @transform_6, window_bounds = array<i64: 1, 32, 256>}]} {
    %c0 = arith.constant 0 : index
    %c0_0 = arith.constant 0 : index
    %c0_1 = arith.constant 0 : index
    %0 = vector.load %arg1[%c0, %c0_0, %c0_1] : memref<1x32x256xf32, #tpu.memory_space<vmem>>, vector<1x32x256xf32>
    %1 = vector.shape_cast %0 : vector<1x32x256xf32> to vector<32x256xf32>
    %c0_2 = arith.constant 0 : index
    %c0_3 = arith.constant 0 : index
    %2 = vector.load %arg2[%c0_2, %c0_3] : memref<1x256xi32, #tpu.memory_space<vmem>>, vector<1x256xi32>
    %c15_i32 = arith.constant 15 : i32
    %3 = vector.broadcast %c15_i32 : i32 to vector<1x256xi32>
    %4 = arith.cmpi ne, %2, %3 : vector<1x256xi32>
    %cst = arith.constant 0.000000e+00 : f32
    %5 = vector.shape_cast %4 : vector<1x256xi1> to vector<1x256xi1>
    %6 = vector.broadcast %5 : vector<1x256xi1> to vector<32x256xi1>
    %7 = vector.broadcast %cst : f32 to vector<32x256xf32>
    %8 = arith.select %6, %1, %7 : vector<32x256xi1>, vector<32x256xf32>
    %c0_i32 = arith.constant 0 : i32
    %9 = vector.broadcast %c0_i32 : i32 to vector<1x256xi32>
    %10 = arith.cmpi ne, %2, %9 : vector<1x256xi32>
    %cst_4 = arith.constant 0.000000e+00 : f32
    %11 = vector.shape_cast %10 : vector<1x256xi1> to vector<1x256xi1>
    %12 = vector.broadcast %11 : vector<1x256xi1> to vector<32x256xi1>
    %13 = vector.broadcast %cst_4 : f32 to vector<32x256xf32>
    %14 = arith.select %12, %1, %13 : vector<32x256xi1>, vector<32x256xf32>
    %cst_5 = arith.constant 0.000000e+00 : f32
    %15 = vector.broadcast %cst_5 : f32 to vector<288x256xf32>
    %c0_6 = arith.constant 0 : index
    %c0_7 = arith.constant 0 : index
    %16 = vector.load %arg8[%c0_6, %c0_7] : memref<288x256xf32, #tpu.memory_space<vmem>>, vector<288x256xf32>
    tpu.vector_store %arg8[%c0_6, %c0_7], %15 {strides = array<i32>} : memref<288x256xf32, #tpu.memory_space<vmem>>, vector<288x256xf32>,
    %17 = vector.extract_strided_slice %8 {offsets = [0, 0], sizes = [32, 239], strides = [1, 1]} : vector<32x256xf32> to vector<32x239xf32>
    %c0_8 = arith.constant 0 : index
    %c17 = arith.constant 17 : index
    %18 = vector.load %arg8[%c0_8, %c17] : memref<288x256xf32, #tpu.memory_space<vmem>>, vector<32x239xf32>
    tpu.vector_store %arg8[%c0_8, %c17], %17 {strides = array<i32>} : memref<288x256xf32, #tpu.memory_space<vmem>>, vector<32x239xf32>,
    %19 = vector.extract_strided_slice %1 {offsets = [0, 0], sizes = [32, 240], strides = [1, 1]} : vector<32x256xf32> to vector<32x240xf32>
    %c32 = arith.constant 32 : index
    %c16 = arith.constant 16 : index
    %20 = vector.load %arg8[%c32, %c16] : memref<288x256xf32, #tpu.memory_space<vmem>>, vector<32x240xf32>
    tpu.vector_store %arg8[%c32, %c16], %19 {strides = array<i32>} : memref<288x256xf32, #tpu.memory_space<vmem>>, vector<32x240xf32>,
    %21 = vector.extract_strided_slice %14 {offsets = [0, 0], sizes = [32, 241], strides = [1, 1]} : vector<32x256xf32> to vector<32x241xf32>
    %c64 = arith.constant 64 : index
    %c15 = arith.constant 15 : index
    %22 = vector.load %arg8[%c64, %c15] : memref<288x256xf32, #tpu.memory_space<vmem>>, vector<32x241xf32>
    tpu.vector_store %arg8[%c64, %c15], %21 {strides = array<i32>} : memref<288x256xf32, #tpu.memory_space<vmem>>, vector<32x241xf32>,
    %23 = vector.extract_strided_slice %8 {offsets = [0, 0], sizes = [32, 255], strides = [1, 1]} : vector<32x256xf32> to vector<32x255xf32>
    %c96 = arith.constant 96 : index
    %c1 = arith.constant 1 : index
    %24 = vector.load %arg8[%c96, %c1] : memref<288x256xf32, #tpu.memory_space<vmem>>, vector<32x255xf32>
    tpu.vector_store %arg8[%c96, %c1], %23 {strides = array<i32>} : memref<288x256xf32, #tpu.memory_space<vmem>>, vector<32x255xf32>,
    %c128 = arith.constant 128 : index
    %c0_9 = arith.constant 0 : index
    %25 = vector.load %arg8[%c128, %c0_9] : memref<288x256xf32, #tpu.memory_space<vmem>>, vector<32x256xf32>
    tpu.vector_store %arg8[%c128, %c0_9], %1 {strides = array<i32>} : memref<288x256xf32, #tpu.memory_space<vmem>>, vector<32x256xf32>,
    %26 = vector.extract_strided_slice %14 {offsets = [0, 1], sizes = [32, 255], strides = [1, 1]} : vector<32x256xf32> to vector<32x255xf32>
    %c160 = arith.constant 160 : index
    %c0_10 = arith.constant 0 : index
    %27 = vector.load %arg8[%c160, %c0_10] : memref<288x256xf32, #tpu.memory_space<vmem>>, vector<32x255xf32>
    tpu.vector_store %arg8[%c160, %c0_10], %26 {strides = array<i32>} : memref<288x256xf32, #tpu.memory_space<vmem>>, vector<32x255xf32>,
    %28 = vector.extract_strided_slice %8 {offsets = [0, 15], sizes = [32, 241], strides = [1, 1]} : vector<32x256xf32> to vector<32x241xf32>
    %c192 = arith.constant 192 : index
    %c0_11 = arith.constant 0 : index
    %29 = vector.load %arg8[%c192, %c0_11] : memref<288x256xf32, #tpu.memory_space<vmem>>, vector<32x241xf32>
    tpu.vector_store %arg8[%c192, %c0_11], %28 {strides = array<i32>} : memref<288x256xf32, #tpu.memory_space<vmem>>, vector<32x241xf32>,
    %30 = vector.extract_strided_slice %1 {offsets = [0, 16], sizes = [32, 240], strides = [1, 1]} : vector<32x256xf32> to vector<32x240xf32>
    %c224 = arith.constant 224 : index
    %c0_12 = arith.constant 0 : index
    %31 = vector.load %arg8[%c224, %c0_12] : memref<288x256xf32, #tpu.memory_space<vmem>>, vector<32x240xf32>
    tpu.vector_store %arg8[%c224, %c0_12], %30 {strides = array<i32>} : memref<288x256xf32, #tpu.memory_space<vmem>>, vector<32x240xf32>,
    %32 = vector.extract_strided_slice %14 {offsets = [0, 17], sizes = [32, 239], strides = [1, 1]} : vector<32x256xf32> to vector<32x239xf32>
    %c256 = arith.constant 256 : index
    %c0_13 = arith.constant 0 : index
    %33 = vector.load %arg8[%c256, %c0_13] : memref<288x256xf32, #tpu.memory_space<vmem>>, vector<32x239xf32>
    tpu.vector_store %arg8[%c256, %c0_13], %32 {strides = array<i32>} : memref<288x256xf32, #tpu.memory_space<vmem>>, vector<32x239xf32>,
    %c0_14 = arith.constant 0 : index
    %c0_15 = arith.constant 0 : index
    %34 = vector.load %arg3[%c0_14, %c0_15] : memref<64x288xf32, #tpu.memory_space<vmem>>, vector<64x288xf32>
    %c0_16 = arith.constant 0 : index
    %c0_17 = arith.constant 0 : index
    %35 = vector.load %arg8[%c0_16, %c0_17] : memref<288x256xf32, #tpu.memory_space<vmem>>, vector<288x256xf32>
    %cst_18 = arith.constant dense<0.000000e+00> : vector<64x256xf32>
    %36 = tpu.matmul %34, %35, %cst_18 {dimension_numbers = #tpu.dot_dimension_numbers<[1], [0], [0], [1], [0, 0, 1, 1], [], []>} : vector<64x288xf32>, vector<288x256xf32>, vector<64x256xf32> -> vector<64x256xf32>
    %c0_19 = arith.constant 0 : index
    %c0_20 = arith.constant 0 : index
    %37 = vector.load %arg4[%c0_19, %c0_20] : memref<64x1xf32, #tpu.memory_space<vmem>>, vector<64x1xf32>
    %38 = vector.broadcast %37 : vector<64x1xf32> to vector<64x256xf32>
    %39 = arith.addf %36, %38 : vector<64x256xf32>
    %40 = vector.extract_strided_slice %39 {offsets = [0, 0], sizes = [32, 256], strides = [1, 1]} : vector<64x256xf32> to vector<32x256xf32>
    %41 = vector.extract_strided_slice %39 {offsets = [32, 0], sizes = [32, 256], strides = [1, 1]} : vector<64x256xf32> to vector<32x256xf32>
    %cst_21 = arith.constant 5.000000e-01 : f32
    %42 = vector.broadcast %cst_21 : f32 to vector<32x256xf32>
    %43 = arith.mulf %42, %41 : vector<32x256xf32>
    %cst_22 = arith.constant 0.707106769 : f32
    %44 = vector.broadcast %cst_22 : f32 to vector<32x256xf32>
    %45 = arith.mulf %41, %44 : vector<32x256xf32>
    %cst_23 = arith.constant 0.000000e+00 : f32
    %46 = vector.broadcast %cst_23 : f32 to vector<32x256xf32>
    %47 = arith.cmpf oge, %45, %46 : vector<32x256xf32>
    %cst_24 = arith.constant 1.000000e+00 : f32
    %cst_25 = arith.constant -1.000000e+00 : f32
    %48 = vector.broadcast %cst_24 : f32 to vector<32x256xf32>
    %49 = vector.broadcast %cst_25 : f32 to vector<32x256xf32>
    %50 = arith.select %47, %48, %49 : vector<32x256xi1>, vector<32x256xf32>
    %51 = math.absf %45 : vector<32x256xf32>
    %cst_26 = arith.constant 0.327591091 : f32
    %52 = vector.broadcast %cst_26 : f32 to vector<32x256xf32>
    %53 = arith.mulf %52, %51 : vector<32x256xf32>
    %cst_27 = arith.constant 1.000000e+00 : f32
    %54 = vector.broadcast %cst_27 : f32 to vector<32x256xf32>
    %55 = arith.addf %54, %53 : vector<32x256xf32>
    %cst_28 = arith.constant 1.000000e+00 : f32
    %56 = vector.broadcast %cst_28 : f32 to vector<32x256xf32>
    %57 = arith.divf %56, %55 : vector<32x256xf32>
    %cst_29 = arith.constant 1.06140542 : f32
    %58 = vector.broadcast %cst_29 : f32 to vector<32x256xf32>
    %59 = arith.mulf %58, %57 : vector<32x256xf32>
    %cst_30 = arith.constant -1.45315206 : f32
    %60 = vector.broadcast %cst_30 : f32 to vector<32x256xf32>
    %61 = arith.addf %59, %60 : vector<32x256xf32>
    %62 = arith.mulf %61, %57 : vector<32x256xf32>
    %cst_31 = arith.constant 1.42141378 : f32
    %63 = vector.broadcast %cst_31 : f32 to vector<32x256xf32>
    %64 = arith.addf %62, %63 : vector<32x256xf32>
    %65 = arith.mulf %64, %57 : vector<32x256xf32>
    %cst_32 = arith.constant -0.284496725 : f32
    %66 = vector.broadcast %cst_32 : f32 to vector<32x256xf32>
    %67 = arith.addf %65, %66 : vector<32x256xf32>
    %68 = arith.mulf %67, %57 : vector<32x256xf32>
    %cst_33 = arith.constant 0.254829586 : f32
    %69 = vector.broadcast %cst_33 : f32 to vector<32x256xf32>
    %70 = arith.addf %68, %69 : vector<32x256xf32>
    %71 = arith.mulf %70, %57 : vector<32x256xf32>
    %cst_34 = arith.constant 0.000000e+00 : f32
    %72 = vector.broadcast %cst_34 : f32 to vector<32x256xf32>
    %73 = arith.subf %72, %51 : vector<32x256xf32>
    %74 = arith.mulf %73, %51 : vector<32x256xf32>
    %75 = math.exp %74 : vector<32x256xf32>
    %76 = arith.mulf %71, %75 : vector<32x256xf32>
    %cst_35 = arith.constant 1.000000e+00 : f32
    %77 = vector.broadcast %cst_35 : f32 to vector<32x256xf32>
    %78 = arith.subf %77, %76 : vector<32x256xf32>
    %79 = arith.mulf %50, %78 : vector<32x256xf32>
    %cst_36 = arith.constant 1.000000e+00 : f32
    %80 = vector.broadcast %cst_36 : f32 to vector<32x256xf32>
    %81 = arith.addf %80, %79 : vector<32x256xf32>
    %82 = arith.mulf %43, %81 : vector<32x256xf32>
    %83 = arith.mulf %40, %82 : vector<32x256xf32>
    %cst_37 = arith.constant dense<0.000000e+00> : vector<32xf32>
    %84 = vector.multi_reduction <add>, %83, %cst_37 [1] : vector<32x256xf32> to vector<32xf32>
    %85 = vector.shape_cast %84 : vector<32xf32> to vector<32x1xf32>
    %cst_38 = arith.constant 2.560000e+02 : f32
    %86 = vector.broadcast %cst_38 : f32 to vector<32x1xf32>
    %87 = arith.divf %85, %86 : vector<32x1xf32>
    %88 = vector.broadcast %87 : vector<32x1xf32> to vector<32x256xf32>
    %89 = arith.subf %83, %88 : vector<32x256xf32>
    %90 = arith.mulf %89, %89 : vector<32x256xf32>
    %cst_39 = arith.constant dense<0.000000e+00> : vector<32xf32>
    %91 = vector.multi_reduction <add>, %90, %cst_39 [1] : vector<32x256xf32> to vector<32xf32>
    %92 = vector.shape_cast %91 : vector<32xf32> to vector<32x1xf32>
    %cst_40 = arith.constant 2.560000e+02 : f32
    %93 = vector.broadcast %cst_40 : f32 to vector<32x1xf32>
    %94 = arith.divf %92, %93 : vector<32x1xf32>
    %cst_41 = arith.constant 9.99999974E-6 : f32
    %95 = vector.broadcast %cst_41 : f32 to vector<32x1xf32>
    %96 = arith.addf %94, %95 : vector<32x1xf32>
    %97 = math.rsqrt %96 : vector<32x1xf32>
    %98 = vector.broadcast %97 : vector<32x1xf32> to vector<32x256xf32>
    %99 = arith.mulf %89, %98 : vector<32x256xf32>
    %c0_42 = arith.constant 0 : index
    %c0_43 = arith.constant 0 : index
    %100 = vector.load %arg5[%c0_42, %c0_43] : memref<32x32xf32, #tpu.memory_space<vmem>>, vector<32x32xf32>
    %cst_44 = arith.constant dense<0.000000e+00> : vector<32x256xf32>
    %101 = tpu.matmul %100, %99, %cst_44 {dimension_numbers = #tpu.dot_dimension_numbers<[1], [0], [0], [1], [0, 0, 1, 1], [], []>} : vector<32x32xf32>, vector<32x256xf32>, vector<32x256xf32> -> vector<32x256xf32>
    %c0_45 = arith.constant 0 : index
    %c0_46 = arith.constant 0 : index
    %102 = vector.load %arg6[%c0_45, %c0_46] : memref<32x1xf32, #tpu.memory_space<vmem>>, vector<32x1xf32>
    %103 = vector.broadcast %102 : vector<32x1xf32> to vector<32x256xf32>
    %104 = arith.addf %101, %103 : vector<32x256xf32>
    %105 = arith.addf %104, %1 : vector<32x256xf32>
    %c0_47 = arith.constant 0 : index
    %c0_48 = arith.constant 0 : index
    %c0_49 = arith.constant 0 : index
    %106 = vector.load %arg7[%c0_47, %c0_48, %c0_49] : memref<1x32x256xf32, #tpu.memory_space<vmem>>, vector<1x32x256xf32>
    %107 = vector.shape_cast %106 : vector<1x32x256xf32> to vector<32x256xf32>
    %108 = vector.shape_cast %105 : vector<32x256xf32> to vector<1x32x256xf32>
    tpu.vector_store %arg7[%c0_47, %c0_48, %c0_49], %108 {strides = array<i32>} : memref<1x32x256xf32, #tpu.memory_space<vmem>>, vector<1x32x256xf32>,
    return
  }
  func.func @transform_0(%arg0: i32) -> (i32, i32, i32) {
    %c0_i32 = arith.constant 0 : i32
    %c0_i32_0 = arith.constant 0 : i32
    %c0_i32_1 = arith.constant 0 : i32
    return %arg0, %c0_i32, %c0_i32_0 : i32, i32, i32
  }
  func.func @transform_1(%arg0: i32) -> (i32, i32) {
    %c0_i32 = arith.constant 0 : i32
    %c0_i32_0 = arith.constant 0 : i32
    %c0_i32_1 = arith.constant 0 : i32
    return %c0_i32, %c0_i32_0 : i32, i32
  }
  func.func @transform_2(%arg0: i32) -> (i32, i32) {
    %c0_i32 = arith.constant 0 : i32
    %c0_i32_0 = arith.constant 0 : i32
    %c0_i32_1 = arith.constant 0 : i32
    return %c0_i32, %c0_i32_0 : i32, i32
  }
  func.func @transform_3(%arg0: i32) -> (i32, i32) {
    %c0_i32 = arith.constant 0 : i32
    %c0_i32_0 = arith.constant 0 : i32
    %c0_i32_1 = arith.constant 0 : i32
    return %c0_i32, %c0_i32_0 : i32, i32
  }
  func.func @transform_4(%arg0: i32) -> (i32, i32) {
    %c0_i32 = arith.constant 0 : i32
    %c0_i32_0 = arith.constant 0 : i32
    %c0_i32_1 = arith.constant 0 : i32
    return %c0_i32, %c0_i32_0 : i32, i32
  }
  func.func @transform_5(%arg0: i32) -> (i32, i32) {
    %c0_i32 = arith.constant 0 : i32
    %c0_i32_0 = arith.constant 0 : i32
    %c0_i32_1 = arith.constant 0 : i32
    return %c0_i32, %c0_i32_0 : i32, i32
  }
  func.func @transform_6(%arg0: i32) -> (i32, i32, i32) {
    %c0_i32 = arith.constant 0 : i32
    %c0_i32_0 = arith.constant 0 : i32
    %c0_i32_1 = arith.constant 0 : i32
    return %arg0, %c0_i32, %c0_i32_0 : i32, i32, i32
  }
}

</mosaic_0001>

<bundles_post_ra>
// kernel: tpu_custom_call.1
= control target key start
LH: loop header
LB: loop body
LE: loop exit
PB: predicated region body
PF: predicated region fallthrough
CT: control target
= control target key end

     0   :  { %11 = vsyncpa [#allocation4], 0  ;;  %s3323_s0 = inlined_call_operand.hbm [shape: f32[2,32,256], index: 0, kind: input, shape index: {}]   ;;  %s3324_s1 = inlined_call_operand.vmem [shape: s32[1,256], index: 1, kind: input, shape index: {}]   ;;  %s3325_s2 = inlined_call_operand.hbm [shape: f32[64,288], index: 2, kind: input, shape index: {}]   ;;  %s3326_s3 = inlined_call_operand.vmem [shape: f32[64,1], index: 3, kind: input, shape index: {}]   ;;  %s3327_s4 = inlined_call_operand.vmem [shape: f32[32,32], index: 4, kind: input, shape index: {}]   ;;  %s3328_s5 = inlined_call_operand.vmem [shape: f32[32,1], index: 5, kind: input, shape index: {}]   ;;  %s3329_s6 = inlined_call_operand.hbm [shape: f32[2,32,256], index: 6, kind: output, shape index: {}]  }
   0x1   :  { %13 = vsyncpa [#allocation4 + $0x1], 0 }
   0x2   :  { %14 = vsyncpa [#allocation7], 0 }
   0x3   :  { %15 = vsyncpa [#allocation5], 0 }
   0x4   :  { %17 = vsyncpa [#allocation5 + $0x1], 0  ;;  %s2151_s21 = smov 0   ;;  %s2153_s22 = smov 0  }
   0x5   :  { %s2155_s23 = smov 0   ;;  %s2157_s24 = smov 0  }
   0x6 LB: > { %s2172_s25 = sadd.s32 4294967295, %s2096_s24   ;;  %s1793_s26 = sadd.s32 4294967294, %s2096_s24   ;;  %s2096_s24 = sphi %s2157_s24, %s3375_s24   ;;  %s2092_s23 = sphi %s2155_s23, %s3374_s23   ;;  %s2088_s22 = sphi %s2153_s22, %s3373_s22   ;;  %s2084_s21 = sphi %s2151_s21, %s3372_s21  }
   0x7   : > { %p43_p0 = scmp.ne.s32.totalorder %s2088_s22, %s2084_s21  ;;  %p44_p1 = scmp.eq.s32.totalorder %s2172_s25, 0 }
   0x8   : > { %p172_p2 = scmp.eq.s32.totalorder %s2172_s25, 1  ;;  %p178_p3 = scmp.eq.s32.totalorder %s1793_s26, 1 }
   0x9   : > { %p2181_p4 = por %p44_p1, %p43_p0  ;;  %p1794_p5 = scmp.ge.s32.totalorder %s2096_s24, 1 }
   0xa   : > { %p2186_p6 = por %p178_p3, %p43_p0  ;;  %p185_p7 = scmp.lt.s32.totalorder %s2096_s24, 3 }
   0xb   : > { %s199_s7 = sshll.u32 %s3325_s2, 4  ;;  %s2098_s9 = smov [#allocation6]   ;;  %s200_s7 = int_to_ptr.hbm [resolvable:$true] %s199_s7 }
   0xc   : > { %p2194_p8 = pnand %p1794_p5, %p185_p7  ;;  %s201_s10 = sshll.u32 %s2098_s9, 4  ;;  %s202_s10 = int_to_ptr.vmem [resolvable:$true] %s201_s10 }
   0xd   : > { %s2204_s11 = sadd.s32 1, %s2096_s24   ;;  %s2099_s12 = smov 384  }
   0xe   : > { %p1847_p9 = pneg %p2194_p8  ;;  %s2100_s13 = smov 24  }
   0xf   : > { %s27_s14 = ssub.s32 %s2096_s24, %s2204_s11  ;;  %s30_s15 = sadd.s32 1, %s2092_s23 }
  0x10   : > { %p1848_p10 = pnand %p1847_p9, %p44_p1  ;;  %p28_p12 = scmp.eq.s32.totalorder %s27_s14, 0 }
  0x11   : > { %p37_p13 = scmp.ne.s32.totalorder %s2092_s23, %s2088_s22  ;;  %p38_p0 = scmp.eq.s32.totalorder %s2096_s24, 0 }
  0x12   : > { %1850 = dma.hbm_to_vmem [thread:$0]  (!%p1848_p10), %s200_s7, 3072, %s202_s10, [#allocation7], %s2099_s12, %s2099_s12, %s2100_s13  }
  0x13   : > { %p1860_p3 = scmp.lt.s32.totalorder %s2096_s24, 2  ;;  %p39_p5 = por %p38_p0, %p37_p13 }
  0x14   : > { %s2214_s16 = scalar_select %p28_p12, %s2092_s23, %s30_s15  }
  0x15   : > { %p2218_p7 = por %p172_p2, %p37_p13  ;;  %s224_s18 = sand.u32 1, %s2092_s23  }
  0x16   : > { %s1833_s19 = sshll.u32 %s2096_s24, 6  ;;  %s1797_s20 = sshll.u32 %s224_s18, 6 }
  0x17   : > { %s233_s30 = scalar_lea.hbm %s3323_s0, %s1833_s19  ;;  %s228_s9 = scalar_lea.vmem [#allocation3], %s1797_s20 }
  0x18   : > { %s234_s7 = sshll.u32 %s233_s30, 4  ;;  %s236_s10 = sshll.u32 %s228_s9, 4  ;;  %s235_s7 = int_to_ptr.hbm [resolvable:$true] %s234_s7  ;;  %s237_s10 = int_to_ptr.vmem [resolvable:$true] %s236_s10 }
  0x19   : > { %p2229_p9 = pnand %p1860_p3, %p39_p5  ;;  %s225_s13 = scalar_lea.sflag [#allocation4], %s224_s18 }
  0x1a   : > { %s1996_s14 = sshra.s32 %s235_s7, 4  ;;  %s2003_s26 = scalar_lea.hbm %s3323_s0, 128  ;;  %s1997_s14 = int_to_ptr.hbm [resolvable:$true] %s1996_s14 }
  0x1b   : > { %s1998_s15 = scalar_lea.hbm %s1997_s14, 64  ;;  %p2000_p10 = pneg %p2229_p9 }
  0x1c   : > { %p1999_p2 = scmp.ne.s32.totalorder %s1997_s14, %s1998_s15  ;;  %p2004_p0 = scmp.lt.s32.totalorder %s1997_s14, %s3323_s0 }
  0x1d   : > { %p2005_p3 = scmp.lt.s32.totalorder %s2003_s26, %s1998_s15 }
  0x1e   : > { %p2001_p12 = pnand %p2000_p10, %p1999_p2 }
  0x1f   : > { %p2006_p5 = por %p2005_p3, %p2004_p0 }
  0x20   : > { %p2002_p13 = pneg %p2001_p12 }
  0x22   : > { %p2007_p11 = pnand %p2006_p5, %p2002_p13 }
  0x24   : > { %2010 = shalt.err (!%p2007_p11)
}
  0x25   : > { %s2101_s18 = smov 256   ;;  %s2102_s9 = smov 16  }
  0x26   : > { %1854 = dma.hbm_to_vmem [thread:$0]  (!%p2229_p9), %s235_s7, 1024, %s237_s10, %s225_s13, %s2101_s18, %s2101_s18, %s2102_s9  }
  0x27   : > { %248 = sbr.rel (%p2194_p8) target bundleno = 1033 (0x409), region = 44 }
  0x2c   : > { %s2246_s19 = sand.u32 1, %s2088_s22  }
  0x2d   : > { %s1801_s14 = sshll.u32 %s2246_s19, 6  ;;  %s251_s15 = scalar_lea.sflag [#allocation4], %s2246_s19 }
  0x2e   : > { %s2252_s20 = scalar_lea.vmem [#allocation3], %s1801_s14 }
  0x2f   : > { %2071 = dma.done.wait (%p2181_p4), %s251_s15, 1024  }
  0x30   : > { %2073 = vsyncadd (%p2181_p4), %s251_s15, 4294966272 }
  0x31   : > { %2075 = dma.done.wait (%p44_p1), [#allocation7], 3072  }
  0x32   : > { %2077 = vsyncadd (%p44_p1), [#allocation7], 4294964224  ;;  %v2103_v0 = vmov 0.0   ;;  %v2104_v1 = vmov 0   ;;  %v2269_v2 = vld [vmem:[%s2252_s20 + $0x30] sm:$0xff]  ;;  %v2279_v6 = vld [vmem:[%s2252_s20 + $0x20] sm:$0xff] }
  0x33   : > { %326 = vst [vmem:[#allocation2] sm:$0xff] %v2103_v0  ;;  %1915 = vset.pattern.permute.xlu0 %v2104_v1  ;;  %1913 = vset.pattern.permute.xlu1 %v2104_v1  ;;  %v297_v3 = vld [vmem:[%s3324_s1] sm:$0x3]  ;;  %v2282_v7 = vld [vmem:[%s2252_s20 + $0x10] sm:$0xff]  ;;  %s2105_s7 = smov 111   ;;  %v2316_v13 = vld [vmem:[%s2252_s20 + $0x38] sm:$0xff] }
  0x34   : > { %328 = vst [vmem:[#allocation2 + $0x10] sm:$0xff] %v2103_v0  ;;  %1914 = vset.pattern.permute.xlu2 %v2104_v1  ;;  %vm312_vm0 = vcmp.ne.s32.totalorder %v297_v3, 0  ;;  %vm298_vm2 = vcmp.ne.s32.totalorder %v297_v3, 15  ;;  %v2323_v15 = vld [vmem:[%s2252_s20 + $0x28] sm:$0xff]  ;;  %v2327_v16 = vld [vmem:[%s2252_s20 + $0x18] sm:$0xff]  ;;  %v2365_v23 = vld [vmem:[%s2252_s20] sm:$0xff] }
  0x35   : > { %330 = vst [vmem:[#allocation2 + $0x20] sm:$0xff] %v2103_v0  ;;  %v313_v4 = vsel %vm312_vm0, 1, %v2104_v1  ;;  %v2329_v17 = vsel %vm298_vm2, 1, %v2104_v1  ;;  %v2369_v24 = vld [vmem:[%s2252_s20 + $0x8] sm:$0xff]  ;;  %s2106_s10 = smov 1   ;;  %s2107_s12 = smov 15  }
  0x36   : > { %332 = vst [vmem:[#allocation2 + $0x30] sm:$0xff] %v2103_v0  ;;  %v314_v5 = vperm.slane %v313_v4, 0  ;;  %v315_v9 = vperm.slane %v313_v4, 1  ;;  %v300_v21 = vperm.slane %v2329_v17, 0  ;;  %s2108_s13 = smov 16   ;;  %s2109_s26 = smov 17  }
  0x37   : > { %334 = vst [vmem:[#allocation2 + $0x40] sm:$0xff] %v2103_v0  ;;  %s2110_s29 = smov 112   ;;  %v301_v31 = vperm.slane %v2329_v17, 1  ;;  %s2111_s30 = smov 113   ;;  %vm709_vm6 = vcmask 908288   ;;  %vm565_vm7 = vcmask 1047560  }
  0x38   : > { %336 = vst [vmem:[#allocation2 + $0x50] sm:$0xff] %v2103_v0  ;;  %vm2285_vm1 = vcmp.eq.s32.totalorder %v314_v5, 1  ;;  %vm2318_vm3 = vcmp.eq.s32.totalorder %v315_v9, 1  ;;  %vm2360_vm4 = vcmp.eq.s32.totalorder %v300_v21, 1  ;;  %s2112_s18 = smov 127   ;;  %vm527_vm8 = vcmask 1047672  }
  0x39   : > { %338 = vst [vmem:[#allocation2 + $0x60] sm:$0xff] %v2103_v0  ;;  %v2293_v10 = vsel %vm2285_vm1, %v2269_v2, 0.0  ;;  %v2299_v11 = vsel %vm2285_vm1, %v2279_v6, 0.0  ;;  %v2304_v12 = vsel %vm2285_vm1, %v2282_v7, 0.0  ;;  %v2336_v18 = vsel %vm2318_vm3, %v2316_v13, 0.0 }
  0x3a   : > { %580 = vst [vmem:[#allocation2 + $0x130] sm:$0xff] %v2269_v2  ;;  %705 = vrot.lane.b32.xlu0 %v2293_v10, %s2105_s7  ;;  %701 = vrot.lane.b32.xlu1 %v2299_v11, %s2105_s7  ;;  %v2341_v19 = vsel %vm2318_vm3, %v2323_v15, 0.0  ;;  %v2347_v20 = vsel %vm2318_vm3, %v2327_v16, 0.0  ;;  %v310_v25 = vsel %vm2360_vm4, %v2269_v2, 0.0  ;;  %v2379_v26 = vsel %vm2285_vm1, %v2365_v23, 0.0 }
  0x3b   : > { %340 = vst [vmem:[#allocation2 + $0x70] sm:$0xff] %v2103_v0  ;;  %697 = vrot.lane.b32.xlu2 %v2304_v12, %s2105_s7  ;;  %v2385_v27 = vsel %vm2318_vm3, %v2369_v24, 0.0  ;;  %v308_v28 = vsel %vm2360_vm4, %v2279_v6, 0.0  ;;  %v306_v29 = vsel %vm2360_vm4, %v2282_v7, 0.0  ;;  %v304_v30 = vsel %vm2360_vm4, %v2365_v23, 0.0 }
  0x3c   : > { %342 = vst [vmem:[#allocation2 + $0x80] sm:$0xff] %v2103_v0  ;;  %vm2443_vm5 = vcmp.eq.s32.totalorder %v301_v31, 1  ;;  %vm481_vm9 = vcmask 1047680   ;;  %vm435_vm10 = vcmask 1047688   ;;  %vm672_vm11 = vcmask 916480  }
  0x3d   : > { %344 = vst [vmem:[#allocation2 + $0x90] sm:$0xff] %v2103_v0  ;;  %v2450_v33 = vsel %vm2443_vm5, %v2316_v13, 0.0  ;;  %v2459_v34 = vsel %vm2443_vm5, %v2323_v15, 0.0  ;;  %v2467_v36 = vsel %vm2443_vm5, %v2327_v16, 0.0  ;;  %v2477_v39 = vsel %vm2443_vm5, %v2369_v24, 0.0 }
  0x3e   : > { %346 = vst [vmem:[#allocation2 + $0xa0] sm:$0xff] %v2103_v0  ;;  %vm635_vm12 = vcmask 924672   ;;  %vm874_vm13 = vcmask 261120   ;;  %vm552_vm14 = vcmask 7168   ;;  %vm598_vm15 = vcmask 1039360  }
  0x3f   : > { %348 = vst [vmem:[#allocation2 + $0xb0] sm:$0xff] %v2103_v0  ;;  %vm514_vm0 = vcmask 121856   ;;  %vm468_vm1 = vcmask 130048   ;;  %vm422_vm2 = vcmask 138240  }
  0x40   : > { %350 = vst [vmem:[#allocation2 + $0xc0] sm:$0xff] %v2103_v0 }
  0x41   : > { %352 = vst [vmem:[#allocation2 + $0xd0] sm:$0xff] %v2103_v0 }
  0x42   : > { %354 = vst [vmem:[#allocation2 + $0xe0] sm:$0xff] %v2103_v0  ;;  %707 = vrot.lane.b32.xlu0 %v2336_v18, %s2105_s7  ;;  %703 = vrot.lane.b32.xlu1 %v2341_v19, %s2105_s7 }
  0x43   : > { %356 = vst [vmem:[#allocation2 + $0xf0] sm:$0xff] %v2103_v0  ;;  %699 = vrot.lane.b32.xlu2 %v2347_v20, %s2105_s7 }
  0x44   : > { %367 = vst [vmem:[#allocation2 + $0x148] sm:$0xff] %v2103_v0 }
  0x45   : > { %369 = vst [vmem:[#allocation2 + $0x158] sm:$0xff] %v2103_v0 }
  0x46   : > { %371 = vst [vmem:[#allocation2 + $0x168] sm:$0xff] %v2103_v0 }
  0x47   : > { %373 = vst [vmem:[#allocation2 + $0x178] sm:$0xff] %v2103_v0 }
  0x48   : > { %375 = vst [vmem:[#allocation2 + $0x188] sm:$0xff] %v2103_v0 }
  0x49   : > { %377 = vst [vmem:[#allocation2 + $0x198] sm:$0xff] %v2103_v0 }
  0x4a   : > { %379 = vst [vmem:[#allocation2 + $0x1a8] sm:$0xff] %v2103_v0  ;;  %548 = vrot.lane.b32.xlu0 %v310_v25, %s2106_s10  ;;  %693 = vrot.lane.b32.xlu1 %v2379_v26, %s2105_s7 }
  0x4b   : > { %381 = vst [vmem:[#allocation2 + $0x1b8] sm:$0xff] %v2103_v0  ;;  %695 = vrot.lane.b32.xlu2 %v2385_v27, %s2105_s7 }
  0x4c   : > { %383 = vst [vmem:[#allocation2 + $0x1c8] sm:$0xff] %v2103_v0 }
  0x4d   : > { %385 = vst [vmem:[#allocation2 + $0x1d8] sm:$0xff] %v2103_v0 }
  0x4e   : > { %387 = vst [vmem:[#allocation2 + $0x1e8] sm:$0xff] %v2103_v0 }
  0x4f   : > { %389 = vst [vmem:[#allocation2 + $0x1f8] sm:$0xff] %v2103_v0 }
  0x50   : > { %391 = vst [vmem:[#allocation2 + $0x208] sm:$0xff] %v2103_v0 }
  0x51   : > { %393 = vst [vmem:[#allocation2 + $0x218] sm:$0xff] %v2103_v0 }
  0x52   : > { %395 = vst [vmem:[#allocation2 + $0x228] sm:$0xff] %v2103_v0  ;;  %544 = vrot.lane.b32.xlu0 %v308_v28, %s2106_s10  ;;  %540 = vrot.lane.b32.xlu1 %v306_v29, %s2106_s10 }
  0x53   : > { %397 = vst [vmem:[#allocation2 + $0x238] sm:$0xff] %v2103_v0  ;;  %536 = vrot.lane.b32.xlu2 %v304_v30, %s2106_s10 }
  0x54   : > { %578 = vst [vmem:[#allocation2 + $0x120] sm:$0xff] %v2279_v6 }
  0x55   : > { %576 = vst [vmem:[#allocation2 + $0x110] sm:$0xff] %v2282_v7 }
  0x56   : > { %581 = vst [vmem:[#allocation2 + $0x138] sm:$0xff] %v2316_v13 }
  0x57   : > { %579 = vst [vmem:[#allocation2 + $0x128] sm:$0xff] %v2323_v15 }
  0x58   : > { %577 = vst [vmem:[#allocation2 + $0x118] sm:$0xff] %v2327_v16 }
  0x59   : > { %575 = vst [vmem:[#allocation2 + $0x108] sm:$0xff] %v2369_v24 }
  0x5a   : > { %574 = vst [vmem:[#allocation2 + $0x100] sm:$0xff] %v2365_v23  ;;  %510 = vrot.lane.b32.xlu0 %v2293_v10, %s2107_s12  ;;  %506 = vrot.lane.b32.xlu1 %v2299_v11, %s2107_s12 }
  0x5b   : > { %502 = vrot.lane.b32.xlu2 %v2304_v12, %s2107_s12 }
  0x62   : > { %498 = vrot.lane.b32.xlu0 %v2379_v26, %s2107_s12  ;;  %464 = vrot.lane.b32.xlu1 %v2269_v2, %s2108_s13 }
  0x63   : > { %460 = vrot.lane.b32.xlu2 %v2279_v6, %s2108_s13 }
  0x6a   : > { %456 = vrot.lane.b32.xlu0 %v2282_v7, %s2108_s13  ;;  %452 = vrot.lane.b32.xlu1 %v2365_v23, %s2108_s13 }
  0x6b   : > { %418 = vrot.lane.b32.xlu2 %v310_v25, %s2109_s26 }
  0x72   : > { %414 = vrot.lane.b32.xlu0 %v308_v28, %s2109_s26  ;;  %668 = vrot.lane.b32.xlu1 %v2269_v2, %s2110_s29 }
  0x73   : > { %670 = vrot.lane.b32.xlu2 %v2316_v13, %s2110_s29 }
  0x7a   : > { %410 = vrot.lane.b32.xlu0 %v306_v29, %s2109_s26  ;;  %664 = vrot.lane.b32.xlu1 %v2279_v6, %s2110_s29 }
  0x7b   : > { %666 = vrot.lane.b32.xlu2 %v2323_v15, %s2110_s29 }
  0x82   : > { %660 = vrot.lane.b32.xlu1 %v2282_v7, %s2110_s29  ;;  %406 = vrot.lane.b32.xlu0 %v304_v30, %s2109_s26 }
  0x83   : > { %662 = vrot.lane.b32.xlu2 %v2327_v16, %s2110_s29 }
  0x8a   : > { %656 = vrot.lane.b32.xlu1 %v2365_v23, %s2110_s29  ;;  %550 = vrot.lane.b32.xlu0 %v2450_v33, %s2106_s10 }
  0x8b   : > { %658 = vrot.lane.b32.xlu2 %v2369_v24, %s2110_s29 }
  0x92   : > { %631 = vrot.lane.b32.xlu1 %v310_v25, %s2111_s30  ;;  %546 = vrot.lane.b32.xlu0 %v2459_v34, %s2106_s10 }
  0x93   : > { %633 = vrot.lane.b32.xlu2 %v2450_v33, %s2111_s30 }
  0x95   : > { %v698_v35 = vpop.permute.xlu2 %697 }
  0x9a   : > { %627 = vrot.lane.b32.xlu1 %v308_v28, %s2111_s30  ;;  %542 = vrot.lane.b32.xlu0 %v2467_v36, %s2106_s10 }
  0x9b   : > { %629 = vrot.lane.b32.xlu2 %v2459_v34, %s2111_s30 }
  0x9d   : > { %v700_v37 = vpop.permute.xlu2 %699 }
  0x9e   : > { %v711_v38 = vsel %vm709_vm6, %v698_v35, %v700_v37  ;;  %725 = vst.msk [vmem:[#allocation2 + $0x218] sm:$0xff] %vm709_vm6, %v700_v37 }
  0xa2   : > { %623 = vrot.lane.b32.xlu1 %v306_v29, %s2111_s30  ;;  %538 = vrot.lane.b32.xlu0 %v2477_v39, %s2106_s10  ;;  %s2046_s10 = scalar_lea.hbm %s3329_s6, 128 }
  0xa3   : > { %625 = vrot.lane.b32.xlu2 %v2467_v36, %s2111_s30 }
  0xa5   : > { %v696_v40 = vpop.permute.xlu2 %695 }
  0xa6   : > { %723 = vst.msk [vmem:[#allocation2 + $0x208] sm:$0xff] %vm709_vm6, %v696_v40 }
  0xaa   : > { %619 = vrot.lane.b32.xlu1 %v304_v30, %s2111_s30  ;;  %512 = vrot.lane.b32.xlu0 %v2336_v18, %s2107_s12 }
  0xab   : > { %621 = vrot.lane.b32.xlu2 %v2477_v39, %s2111_s30 }
  0xac   : > { %v706_v41 = vpop.permute.xlu0 %705  ;;  %v702_v42 = vpop.permute.xlu1 %701 }
  0xad   : > { %v2486_v43 = vpop.permute.xlu2 %536 }
  0xae   : > { %566 = vst.msk [vmem:[#allocation2 + $0xc0] sm:$0xff] %vm565_vm7, %v2486_v43 }
  0xb2   : > { %594 = vrot.lane.b32.xlu1 %v2293_v10, %s2112_s18  ;;  %508 = vrot.lane.b32.xlu0 %v2341_v19, %s2107_s12 }
  0xb3   : > { %596 = vrot.lane.b32.xlu2 %v2336_v18, %s2112_s18 }
  0xb4   : > { %v708_v44 = vpop.permute.xlu0 %707  ;;  %v704_v45 = vpop.permute.xlu1 %703 }
  0xb5   : > { %v713_v46 = vsel %vm709_vm6, %v706_v41, %v708_v44  ;;  %729 = vst.msk [vmem:[#allocation2 + $0x238] sm:$0xff] %vm709_vm6, %v708_v44  ;;  %v712_v47 = vsel %vm709_vm6, %v702_v42, %v704_v45  ;;  %v2499_v48 = vpop.permute.xlu2 %502  ;;  %v778_v62 = vld [vmem:[#allocation2 + $0xc0] sm:$0xff]  ;;  %v2602_v41 = vld [vmem:[#allocation6 + $0x10] sm:$0xff] }
  0xb6   : > { %993 = vmatpush.msra.mxu2 %v713_v46  ;;  %727 = vst.msk [vmem:[#allocation2 + $0x228] sm:$0xff] %vm709_vm6, %v704_v45 }
  0xb7   : > { %530 = vst.msk [vmem:[#allocation2 + $0x90] sm:$0xff] %vm527_vm8, %v2499_v48 }
  0xb8   : > { %994 = vmatpush.msra.mxu2 %v712_v47 }
  0xba   : > { %590 = vrot.lane.b32.xlu1 %v2299_v11, %s2112_s18  ;;  %504 = vrot.lane.b32.xlu0 %v2347_v20, %s2107_s12 }
  0xbb   : > { %592 = vrot.lane.b32.xlu2 %v2341_v19, %s2112_s18  ;;  %995 = vmatpush.msra.mxu2 %v711_v38 }
  0xbc   : > { %v2510_v49 = vpop.permute.xlu0 %548  ;;  %v694_v50 = vpop.permute.xlu1 %693 }
  0xbd   : > { %572 = vst.msk [vmem:[#allocation2 + $0xf0] sm:$0xff] %vm565_vm7, %v2510_v49  ;;  %v710_v51 = vsel %vm709_vm6, %v694_v50, %v696_v40  ;;  %v2515_v52 = vpop.permute.xlu2 %460 }
  0xbe   : > { %996 = vmatpush.msra.mxu2 %v710_v51  ;;  %486 = vst.msk [vmem:[#allocation2 + $0x60] sm:$0xff] %vm481_vm9, %v2515_v52  ;;  %v772_v5 = vld [vmem:[#allocation2 + $0x90] sm:$0xff]  ;;  %v2609_v51 = vld [vmem:[#allocation2 + $0x238] sm:$0xff] }
  0xbf   : > { %1804 = vmatmul.msk.f32.vlgmr.msra.gmra.mxu2 %vm874_vm13, %v2602_v41 }
  0xc2   : > { %586 = vrot.lane.b32.xlu1 %v2304_v12, %s2112_s18  ;;  %500 = vrot.lane.b32.xlu0 %v2385_v27, %s2107_s12 }
  0xc3   : > { %588 = vrot.lane.b32.xlu2 %v2347_v20, %s2112_s18 }
  0xc4   : > { %v2525_v53 = vpop.permute.xlu0 %544  ;;  %v2527_v54 = vpop.permute.xlu1 %540  ;;  %v784_v55 = vld [vmem:[#allocation2 + $0xf0] sm:$0xff] }
  0xc5   : > { %570 = vst.msk [vmem:[#allocation2 + $0xe0] sm:$0xff] %vm565_vm7, %v2525_v53  ;;  %v2531_v56 = vpop.permute.xlu2 %418  ;;  %899 = vmatpush.msra.mxu0 %v784_v55  ;;  %v766_v17 = vld [vmem:[#allocation2 + $0x60] sm:$0xff] }
  0xc6   : > { %568 = vst.msk [vmem:[#allocation2 + $0xd0] sm:$0xff] %vm565_vm7, %v2527_v54 }
  0xc7   : > { %442 = vst.msk [vmem:[#allocation2 + $0x30] sm:$0xff] %vm435_vm10, %v2531_v56 }
  0xca   : > { %582 = vrot.lane.b32.xlu1 %v2379_v26, %s2112_s18  ;;  %466 = vrot.lane.b32.xlu0 %v2316_v13, %s2108_s13 }
  0xcb   : > { %584 = vrot.lane.b32.xlu2 %v2385_v27, %s2112_s18 }
  0xcc   : > { %v2543_v57 = vpop.permute.xlu0 %510  ;;  %v2545_v58 = vpop.permute.xlu1 %506  ;;  %v782_v59 = vld [vmem:[#allocation2 + $0xe0] sm:$0xff] }
  0xcd   : > { %534 = vst.msk [vmem:[#allocation2 + $0xb0] sm:$0xff] %vm527_vm8, %v2543_v57  ;;  %v671_v60 = vpop.permute.xlu2 %670  ;;  %900 = vmatpush.msra.mxu0 %v782_v59  ;;  %v780_v61 = vld [vmem:[#allocation2 + $0xd0] sm:$0xff]  ;;  %v2612_v59 = vld [vmem:[#allocation2 + $0x228] sm:$0xff] }
  0xce   : > { %532 = vst.msk [vmem:[#allocation2 + $0xa0] sm:$0xff] %vm527_vm8, %v2545_v58  ;;  %v760_v27 = vld [vmem:[#allocation2 + $0x30] sm:$0xff] }
  0xcf   : > { %692 = vst.msk [vmem:[#allocation2 + $0x1f8] sm:$0xff] %vm672_vm11, %v671_v60  ;;  %901 = vmatpush.msra.mxu0 %v780_v61  ;;  %v2618_v61 = vld [vmem:[#allocation6] sm:$0xff] }
  0xd1   : > { %902 = vmatpush.msra.mxu0 %v778_v62  ;;  %v2625_v62 = vld [vmem:[#allocation2 + $0x208] sm:$0xff] }
  0xd2   : > { %458 = vrot.lane.b32.xlu1 %v2327_v16, %s2108_s13  ;;  %462 = vrot.lane.b32.xlu0 %v2323_v15, %s2108_s13 }
  0xd3   : > { %454 = vrot.lane.b32.xlu2 %v2369_v24, %s2108_s13 }
  0xd4   : > { %v2558_v63 = vpop.permute.xlu0 %498  ;;  %v2560_v0 = vpop.permute.xlu1 %464  ;;  %v776_v1 = vld [vmem:[#allocation2 + $0xb0] sm:$0xff] }
  0xd5   : > { %528 = vst.msk [vmem:[#allocation2 + $0x80] sm:$0xff] %vm527_vm8, %v2558_v63  ;;  %v667_v3 = vpop.permute.xlu2 %666  ;;  %903 = vmatpush.msra.mxu0 %v776_v1  ;;  %v774_v4 = vld [vmem:[#allocation2 + $0xa0] sm:$0xff] }
  0xd6   : > { %488 = vst.msk [vmem:[#allocation2 + $0x70] sm:$0xff] %vm481_vm9, %v2560_v0  ;;  %v817_v8 = vld [vmem:[#allocation2 + $0x1f8] sm:$0xff] }
  0xd7   : > { %690 = vst.msk [vmem:[#allocation2 + $0x1e8] sm:$0xff] %vm672_vm11, %v667_v3  ;;  %904 = vmatpush.msra.mxu0 %v774_v4  ;;  %1063 = vmatpush.msrb.mxu2 %v817_v8 }
  0xd9   : > { %905 = vmatpush.msra.mxu0 %v772_v5 }
  0xda   : > { %416 = vrot.lane.b32.xlu1 %v2459_v34, %s2109_s26  ;;  %420 = vrot.lane.b32.xlu0 %v2450_v33, %s2109_s26 }
  0xdb   : > { %412 = vrot.lane.b32.xlu2 %v2467_v36, %s2109_s26 }
  0xdc   : > { %v2573_v9 = vpop.permute.xlu0 %456  ;;  %v2575_v10 = vpop.permute.xlu1 %452  ;;  %v770_v11 = vld [vmem:[#allocation2 + $0x80] sm:$0xff] }
  0xdd   : > { %484 = vst.msk [vmem:[#allocation2 + $0x50] sm:$0xff] %vm481_vm9, %v2573_v9  ;;  %v663_v12 = vpop.permute.xlu2 %662  ;;  %906 = vmatpush.msra.mxu0 %v770_v11  ;;  %v768_v14 = vld [vmem:[#allocation2 + $0x70] sm:$0xff] }
  0xde   : > { %482 = vst.msk [vmem:[#allocation2 + $0x40] sm:$0xff] %vm481_vm9, %v2575_v10  ;;  %v815_v18 = vld [vmem:[#allocation2 + $0x1e8] sm:$0xff] }
  0xdf   : > { %688 = vst.msk [vmem:[#allocation2 + $0x1d8] sm:$0xff] %vm672_vm11, %v663_v12  ;;  %907 = vmatpush.msra.mxu0 %v768_v14  ;;  %1064 = vmatpush.msrb.mxu2 %v815_v18  ;;  %v2635_v14 = vld [vmem:[#allocation6 + $0x40] sm:$0xff] }
  0xe1   : > { %908 = vmatpush.msra.mxu0 %v766_v17 }
  0xe2   : > { %408 = vrot.lane.b32.xlu0 %v2477_v39, %s2109_s26  ;;  %s3278_s26 = scalar_lea.vmem [#allocation8], %s1801_s14  ;;  %s1834_s14 = sshll.u32 %s2172_s25, 6 }
  0xe3   : > { %s1706_s18 = scalar_lea.hbm %s3329_s6, %s1834_s14  ;;  %s1707_s9 = sshll.u32 %s3278_s26, 4  ;;  %s1708_s9 = int_to_ptr.vmem [resolvable:$true] %s1707_s9 }
  0xe4   : > { %v2584_v19 = vpop.permute.xlu0 %414  ;;  %v669_v20 = vpop.permute.xlu1 %668  ;;  %v764_v21 = vld [vmem:[#allocation2 + $0x50] sm:$0xff]  ;;  %s1709_s15 = sshll.u32 %s1706_s18, 4  ;;  %s1695_s25 = scalar_lea.sflag [#allocation5], %s2246_s19  ;;  %s1710_s15 = int_to_ptr.hbm [resolvable:$true] %s1709_s15 }
  0xe5   : > { %440 = vst.msk [vmem:[#allocation2 + $0x20] sm:$0xff] %vm435_vm10, %v2584_v19  ;;  %v676_v22 = vsel %vm672_vm11, %v669_v20, %v671_v60  ;;  %v659_v25 = vpop.permute.xlu2 %658  ;;  %909 = vmatpush.msra.mxu0 %v764_v21  ;;  %v762_v26 = vld [vmem:[#allocation2 + $0x40] sm:$0xff]  ;;  %v2616_v60 = vld [vmem:[#allocation2 + $0x218] sm:$0xff]  ;;  %s2040_s20 = sshra.s32 %s1710_s15, 4  ;;  %s2041_s20 = int_to_ptr.hbm [resolvable:$true] %s2040_s20 }
  0xe6   : > { %940 = vmatpush.msra.mxu1 %v676_v22  ;;  %v813_v28 = vld [vmem:[#allocation2 + $0x1d8] sm:$0xff]  ;;  %686 = vst.msk [vmem:[#allocation2 + $0x1c8] sm:$0xff] %vm672_vm11, %v659_v25  ;;  %s2042_s27 = scalar_lea.hbm %s2041_s20, 64  ;;  %p2047_p11 = scmp.lt.s32.totalorder %s2041_s20, %s3329_s6 }
  0xe7   : > { %910 = vmatpush.msra.mxu0 %v762_v26  ;;  %1065 = vmatpush.msrb.mxu2 %v813_v28  ;;  %v2646_v26 = vld [vmem:[#allocation6 + $0x58] sm:$0xff]  ;;  %p2043_p1 = scmp.ne.s32.totalorder %s2041_s20, %s2042_s27  ;;  %p2048_p9 = scmp.lt.s32.totalorder %s2046_s10, %s2042_s27 }
  0xe9   : > { %911 = vmatpush.msra.mxu0 %v760_v27  ;;  %p2044_p4 = pnand %p2043_p1, %p2218_p7  ;;  %p2049_p2 = por %p2048_p9, %p2047_p11 }
  0xeb   : > { %p2045_p8 = pneg %p2044_p4 }
  0xec   : > { %v2590_v29 = vpop.permute.xlu0 %410  ;;  %v665_v30 = vpop.permute.xlu1 %664  ;;  %v758_v31 = vld [vmem:[#allocation2 + $0x20] sm:$0xff] }
  0xed   : > { %438 = vst.msk [vmem:[#allocation2 + $0x10] sm:$0xff] %vm435_vm10, %v2590_v29  ;;  %v675_v32 = vsel %vm672_vm11, %v665_v30, %v667_v3  ;;  %v634_v33 = vpop.permute.xlu2 %633  ;;  %912 = vmatpush.msra.mxu0 %v758_v31  ;;  %v811_v34 = vld [vmem:[#allocation2 + $0x1c8] sm:$0xff]  ;;  %p2050_p10 = pnand %p2049_p2, %p2045_p8 }
  0xee   : > { %941 = vmatpush.msra.mxu1 %v675_v32  ;;  %655 = vst.msk [vmem:[#allocation2 + $0x1b8] sm:$0xff] %vm635_vm12, %v634_v33  ;;  %1066 = vmatpush.msrb.mxu2 %v811_v34  ;;  %v2657_v34 = vld [vmem:[#allocation6 + $0x70] sm:$0xff] }
  0xf4   : > { %v661_v35 = vpop.permute.xlu1 %660  ;;  %v2596_v36 = vpop.permute.xlu0 %406  ;;  %v756_v37 = vld [vmem:[#allocation2 + $0x10] sm:$0xff] }
  0xf5   : > { %v674_v38 = vsel %vm672_vm11, %v661_v35, %v663_v12  ;;  %436 = vst.msk [vmem:[#allocation2] sm:$0xff] %vm435_vm10, %v2596_v36  ;;  %v630_v39 = vpop.permute.xlu2 %629  ;;  %913 = vmatpush.msra.mxu0 %v756_v37  ;;  %v809_v40 = vld [vmem:[#allocation2 + $0x1b8] sm:$0xff] }
  0xf6   : > { %942 = vmatpush.msra.mxu1 %v674_v38  ;;  %653 = vst.msk [vmem:[#allocation2 + $0x1a8] sm:$0xff] %vm635_vm12, %v630_v39  ;;  %1067 = vmatpush.msrb.mxu2 %v809_v40  ;;  %v2633_v12 = vld [vmem:[#allocation6 + $0x18] sm:$0xff] }
  0xfc   : > { %v657_v42 = vpop.permute.xlu1 %656  ;;  %v551_v44 = vpop.permute.xlu0 %550  ;;  %v754_v45 = vld [vmem:[#allocation2] sm:$0xff] }
  0xfd   : > { %v673_v46 = vsel %vm672_vm11, %v657_v42, %v659_v25  ;;  %v556_v47 = vsel %vm552_vm14, %v2510_v49, %v551_v44  ;;  %v626_v50 = vpop.permute.xlu2 %625  ;;  %914 = vmatpush.msra.mxu0 %v754_v45  ;;  %v807_v55 = vld [vmem:[#allocation2 + $0x1a8] sm:$0xff]  ;;  %v2644_v25 = vld [vmem:[#allocation6 + $0x30] sm:$0xff]  ;;  %v2669_v44 = vld [vmem:[#allocation6 + $0x60] sm:$0xff] }
  0xfe   : > { %1022 = vmatpush.msra.mxu3 %v556_v47  ;;  %943 = vmatpush.msra.mxu1 %v673_v46  ;;  %651 = vst.msk [vmem:[#allocation2 + $0x198] sm:$0xff] %vm635_vm12, %v626_v50  ;;  %v2620_v49 = vld [vmem:[#allocation6 + $0x28] sm:$0xff]  ;;  %v826_v46 = vld [vmem:[%s3326_s3] sm:$0xff] }
  0xff   : > { %1116 = vmatpush.msrb.mxu0 %v2609_v51  ;;  %1068 = vmatpush.msrb.mxu2 %v807_v55  ;;  %v2671_v45 = vld [vmem:[#allocation6 + $0x88] sm:$0xff] }
 0x100   : > { %1805 = vmatmul.msk.f32.gmra.mxu2 %vm874_vm13, %v2620_v49  ;;  %915 = vmatmul.f32.vlgmr.msra.gmra.mxu0 %v2618_v61 }
 0x101   : > { %1117 = vmatpush.msrb.mxu0 %v2612_v59 }
 0x103   : > { %1118 = vmatpush.msrb.mxu0 %v2616_v60 }
 0x104   : > { %v632_v1 = vpop.permute.xlu1 %631  ;;  %v547_v3 = vpop.permute.xlu0 %546 }
 0x105   : > { %1119 = vmatpush.msrb.mxu0 %v2625_v62  ;;  %v639_v4 = vsel %vm635_vm12, %v632_v1, %v634_v33  ;;  %v555_v5 = vsel %vm552_vm14, %v2525_v53, %v547_v3  ;;  %v622_v8 = vpop.permute.xlu2 %621  ;;  %v805_v11 = vld [vmem:[#allocation2 + $0x198] sm:$0xff]  ;;  %v2655_v33 = vld [vmem:[#allocation6 + $0x48] sm:$0xff] }
 0x106   : > { %1023 = vmatpush.msra.mxu3 %v555_v5  ;;  %944 = vmatpush.msra.mxu1 %v639_v4  ;;  %649 = vst.msk [vmem:[#allocation2 + $0x188] sm:$0xff] %vm635_vm12, %v622_v8  ;;  %v2686_v5 = vld [vmem:[#allocation6 + $0x78] sm:$0xff] }
 0x107   : > { %1069 = vmatpush.msrb.mxu2 %v805_v11 }
 0x108   : > { %918 = vmatmul.f32.gmra.mxu0 %v2633_v12  ;;  %1806 = vmatmul.msk.f32.gmra.mxu2 %vm874_vm13, %v2635_v14 }
 0x10c   : > { %v628_v17 = vpop.permute.xlu1 %627  ;;  %v543_v18 = vpop.permute.xlu0 %542 }
 0x10d   : > { %v638_v53 = vsel %vm635_vm12, %v628_v17, %v630_v39  ;;  %v554_v20 = vsel %vm552_vm14, %v2527_v54, %v543_v18  ;;  %v597_v21 = vpop.permute.xlu2 %596  ;;  %v803_v22 = vld [vmem:[#allocation2 + $0x188] sm:$0xff] }
 0x10e   : > { %1024 = vmatpush.msra.mxu3 %v554_v20  ;;  %945 = vmatpush.msra.mxu1 %v638_v53  ;;  %618 = vst.msk [vmem:[#allocation2 + $0x178] sm:$0xff] %vm598_vm15, %v597_v21 }
 0x10f   : > { %1070 = vmatpush.msrb.mxu2 %v803_v22 }
 0x110   : > { %921 = vmatmul.f32.gmra.mxu0 %v2644_v25  ;;  %1807 = vmatmul.msk.f32.gmra.mxu2 %vm874_vm13, %v2646_v26 }
 0x114   : > { %v624_v27 = vpop.permute.xlu1 %623  ;;  %v539_v28 = vpop.permute.xlu0 %538 }
 0x115   : > { %v637_v54 = vsel %vm635_vm12, %v624_v27, %v626_v50  ;;  %v553_v30 = vsel %vm552_vm14, %v2486_v43, %v539_v28  ;;  %v593_v31 = vpop.permute.xlu2 %592  ;;  %v801_v32 = vld [vmem:[#allocation2 + $0x178] sm:$0xff]  ;;  %v831_v43 = vld [vmem:[%s3326_s3 + $0x28] sm:$0xff]  ;;  %v2701_v27 = vld [vmem:[#allocation6 + $0x90] sm:$0xff] }
 0x116   : > { %1025 = vmatpush.msra.mxu3 %v553_v30  ;;  %946 = vmatpush.msra.mxu1 %v637_v54  ;;  %616 = vst.msk [vmem:[#allocation2 + $0x168] sm:$0xff] %vm598_vm15, %v593_v31  ;;  %v2703_v28 = vld [vmem:[#allocation6 + $0xb8] sm:$0xff] }
 0x117   : > { %1071 = vmatpush.msrb.mxu2 %v801_v32  ;;  %861 = vperm.xlu0 %1915, %v831_v43  }
 0x118   : > { %924 = vmatmul.f32.gmra.mxu0 %v2655_v33  ;;  %1808 = vmatmul.msk.f32.gmra.mxu2 %vm874_vm13, %v2657_v34 }
 0x11c   : > { %v620_v35 = vpop.permute.xlu1 %619  ;;  %v513_v37 = vpop.permute.xlu0 %512 }
 0x11d   : > { %v636_v38 = vsel %vm635_vm12, %v620_v35, %v622_v8  ;;  %v518_v39 = vsel %vm514_vm0, %v2543_v57, %v513_v37  ;;  %v589_v40 = vpop.permute.xlu2 %588  ;;  %v799_v42 = vld [vmem:[#allocation2 + $0x168] sm:$0xff]  ;;  %v833_v57 = vld [vmem:[%s3326_s3 + $0x38] sm:$0xff]  ;;  %v2688_v8 = vld [vmem:[#allocation6 + $0xa0] sm:$0xff] }
 0x11e   : > { %1026 = vmatpush.msra.mxu3 %v518_v39  ;;  %947 = vmatpush.msra.mxu1 %v636_v38  ;;  %614 = vst.msk [vmem:[#allocation2 + $0x158] sm:$0xff] %vm598_vm15, %v589_v40  ;;  %v2722_v35 = vld [vmem:[#allocation6 + $0xa8] sm:$0xff] }
 0x11f   : > { %1072 = vmatpush.msrb.mxu2 %v799_v42  ;;  %871 = vperm.xlu1 %1913, %v833_v57  }
 0x120   : > { %927 = vmatmul.f32.gmra.mxu0 %v2669_v44  ;;  %1809 = vmatmul.msk.f32.gmra.mxu2 %vm874_vm13, %v2671_v45 }
 0x121   : > { %836 = vperm.xlu0 %1915, %v826_v46  }
 0x124   : > { %v595_v47 = vpop.permute.xlu1 %594  ;;  %v509_v50 = vpop.permute.xlu0 %508 }
 0x125   : > { %v602_v55 = vsel %vm598_vm15, %v595_v47, %v597_v21  ;;  %v517_v1 = vsel %vm514_vm0, %v2545_v58, %v509_v50  ;;  %v585_v3 = vpop.permute.xlu2 %584  ;;  %v797_v4 = vld [vmem:[#allocation2 + $0x158] sm:$0xff]  ;;  %v830_v58 = vld [vmem:[%s3326_s3 + $0x20] sm:$0xff] }
 0x126   : > { %1027 = vmatpush.msra.mxu3 %v517_v1  ;;  %948 = vmatpush.msra.mxu1 %v602_v55  ;;  %612 = vst.msk [vmem:[#allocation2 + $0x148] sm:$0xff] %vm598_vm15, %v585_v3 }
 0x127   : > { %1073 = vmatpush.msrb.mxu2 %v797_v4  ;;  %856 = vperm.xlu1 %1913, %v830_v58  }
 0x128   : > { %930 = vmatmul.f32.gmra.mxu0 %v2686_v5  ;;  %1810 = vmatmul.msk.f32.gmra.mxu2 %vm874_vm13, %v2688_v8 }
 0x12c   : > { %v591_v11 = vpop.permute.xlu1 %590  ;;  %v505_v17 = vpop.permute.xlu0 %504 }
 0x12d   : > { %v601_v18 = vsel %vm598_vm15, %v591_v11, %v593_v31  ;;  %v516_v53 = vsel %vm514_vm0, %v2499_v48, %v505_v17  ;;  %v455_v20 = vpop.permute.xlu2 %454  ;;  %v795_v22 = vld [vmem:[#allocation2 + $0x148] sm:$0xff]  ;;  %v828_v48 = vld [vmem:[%s3326_s3 + $0x10] sm:$0xff] }
 0x12e   : > { %v469_v21 = vsel %vm468_vm1, %v2575_v10, %v455_v20  ;;  %1028 = vmatpush.msra.mxu3 %v516_v53  ;;  %949 = vmatpush.msra.mxu1 %v601_v18  ;;  %v832_v10 = vld [vmem:[%s3326_s3 + $0x30] sm:$0xff] }
 0x12f   : > { %1074 = vmatpush.msrb.mxu2 %v795_v22  ;;  %846 = vperm.xlu1 %1913, %v828_v48  }
 0x130   : > { %933 = vmatmul.f32.gmra.mxu0 %v2701_v27  ;;  %1811 = vmatmul.msk.f32.gmra.mxu2 %vm874_vm13, %v2703_v28 }
 0x131   : > { %1075 = vmatpush.msrb.mxu2 %v2316_v13  ;;  %866 = vperm.xlu2 %1914, %v832_v10  }
 0x133   : > { %1076 = vmatpush.msrb.mxu2 %v2323_v15  ;;  %v731_v15 = vld [vmem:[#allocation6 + $0x8] sm:$0xff] }
 0x134   : > { %v587_v54 = vpop.permute.xlu1 %586  ;;  %v501_v30 = vpop.permute.xlu0 %500 }
 0x135   : > { %v600_v13 = vsel %vm598_vm15, %v587_v54, %v589_v40  ;;  %v515_v31 = vsel %vm514_vm0, %v2558_v63, %v501_v30  ;;  %v413_v32 = vpop.permute.xlu2 %412  ;;  %1077 = vmatpush.msrb.mxu2 %v2327_v16  ;;  %v829_v63 = vld [vmem:[%s3326_s3 + $0x18] sm:$0xff]  ;;  %v734_v16 = vld [vmem:[#allocation6 + $0x20] sm:$0xff] }
 0x136   : > { %v424_v43 = vsel %vm422_vm2, %v2590_v29, %v413_v32  ;;  %1029 = vmatpush.msra.mxu3 %v515_v31  ;;  %950 = vmatpush.msra.mxu1 %v600_v13 }
 0x137   : > { %1078 = vmatpush.msrb.mxu2 %v2369_v24  ;;  %v827_v24 = vld [vmem:[%s3326_s3 + $0x8] sm:$0xff] }
 0x138   : > { %936 = vmatmul.f32.gmra.mxu0 %v2722_v35  ;;  %1079 = vmatmul.f32.vlgmr.msrb.gmra.mxu2 %v731_v15 }
 0x139   : > { %851 = vperm.xlu2 %1914, %v829_v63  }
 0x13c   : > { %v583_v37 = vpop.permute.xlu1 %582  ;;  %v467_v38 = vpop.permute.xlu0 %466 }
 0x13d   : > { %v599_v29 = vsel %vm598_vm15, %v583_v37, %v585_v3  ;;  %v472_v39 = vsel %vm468_vm1, %v2560_v0, %v467_v38 }
 0x13e   : > { %951 = vmatpush.msra.mxu1 %v599_v29  ;;  %1030 = vmatpush.msra.mxu3 %v472_v39 }
 0x140   : > { %952 = vmatpush.msra.mxu1 %v2269_v2  ;;  %1082 = vmatmul.f32.gmra.mxu2 %v734_v16 }
 0x141   : > { %1812 = vmatmul.msk.f32.vlgmr.msrb.gmra.mxu0 %vm874_vm13, %v2602_v41  ;;  %841 = vperm.xlu2 %1914, %v827_v24   ;;  %v740_v41 = vld [vmem:[#allocation6 + $0x50] sm:$0xff] }
 0x142   : > { %953 = vmatpush.msra.mxu1 %v2279_v6  ;;  %v737_v6 = vld [vmem:[#allocation6 + $0x38] sm:$0xff] }
 0x144   : > { %v459_v40 = vpop.permute.xlu1 %458  ;;  %v463_v42 = vpop.permute.xlu0 %462  ;;  %954 = vmatpush.msra.mxu1 %v2282_v7 }
 0x145   : > { %v470_v0 = vsel %vm468_vm1, %v2573_v9, %v459_v40  ;;  %v471_v2 = vsel %vm468_vm1, %v2515_v52, %v463_v42 }
 0x146   : > { %955 = vmatpush.msra.mxu1 %v2365_v23  ;;  %1031 = vmatpush.msra.mxu3 %v471_v2 }
 0x147   : > { %956 = vmatmul.f32.vlgmr.msra.gmra.mxu1 %v731_v15 }
 0x148   : > { %1835 = vmatpush.msrb.mxu1 %v2609_v51  ;;  %1032 = vmatpush.msra.mxu3 %v470_v0 }
 0x149   : > { %1085 = vmatmul.f32.gmra.mxu2 %v737_v6  ;;  %1813 = vmatmul.msk.f32.gmra.mxu0 %vm874_vm13, %v2620_v49 }
 0x14a   : > { %1836 = vmatpush.msrb.mxu1 %v2612_v59  ;;  %1033 = vmatpush.msra.mxu3 %v469_v21 }
 0x14c   : > { %v417_v7 = vpop.permute.xlu1 %416  ;;  %v421_v9 = vpop.permute.xlu0 %420  ;;  %1837 = vmatpush.msrb.mxu1 %v2616_v60  ;;  %v752_v60 = vld [vmem:[#allocation6 + $0xb0] sm:$0xff] }
 0x14d   : > { %v425_v23 = vsel %vm422_vm2, %v2584_v19, %v417_v7  ;;  %v426_v52 = vsel %vm422_vm2, %v2531_v56, %v421_v9  ;;  %v743_v56 = vld [vmem:[#allocation6 + $0x68] sm:$0xff]  ;;  %v746_v19 = vld [vmem:[#allocation6 + $0x80] sm:$0xff] }
 0x14e   : > { %1838 = vmatpush.msrb.mxu1 %v2625_v62  ;;  %1034 = vmatpush.msra.mxu3 %v426_v52 }
 0x14f   : > { %959 = vmatmul.f32.gmra.mxu1 %v734_v16 }
 0x150   : > { %1035 = vmatpush.msra.mxu3 %v425_v23 }
 0x151   : > { %1088 = vmatmul.f32.gmra.mxu2 %v740_v41  ;;  %1814 = vmatmul.msk.f32.gmra.mxu0 %vm874_vm13, %v2635_v14 }
 0x152   : > { %1036 = vmatpush.msra.mxu3 %v424_v43 }
 0x154   : > { %v409_v51 = vpop.permute.xlu0 %408 }
 0x155   : > { %v423_v59 = vsel %vm422_vm2, %v2596_v36, %v409_v51  ;;  %v749_v36 = vld [vmem:[#allocation6 + $0x98] sm:$0xff] }
 0x156   : > { %1037 = vmatpush.msra.mxu3 %v423_v59 }
 0x157   : > { %962 = vmatmul.f32.gmra.mxu1 %v737_v6  ;;  %1038 = vmatmul.f32.vlgmr.msra.gmra.mxu3 %v2618_v61  ;;  %v2770_v61 = vpop.f32.mrf.mxu2 }
 0x159   : > { %1091 = vmatmul.f32.gmra.mxu2 %v743_v56  ;;  %1815 = vmatmul.msk.f32.gmra.mxu0 %vm874_vm13, %v2646_v26 }
 0x15f   : > { %965 = vmatmul.f32.gmra.mxu1 %v740_v41  ;;  %1041 = vmatmul.f32.gmra.mxu3 %v2633_v12 }
 0x161   : > { %1094 = vmatmul.f32.gmra.mxu2 %v746_v19  ;;  %1816 = vmatmul.msk.f32.gmra.mxu0 %vm874_vm13, %v2657_v34 }
 0x167   : > { %968 = vmatmul.f32.gmra.mxu1 %v743_v56  ;;  %1044 = vmatmul.f32.gmra.mxu3 %v2644_v25 }
 0x169   : > { %1097 = vmatmul.f32.gmra.mxu2 %v749_v36  ;;  %1817 = vmatmul.msk.f32.gmra.mxu0 %vm874_vm13, %v2671_v45 }
 0x16f   : > { %971 = vmatmul.f32.gmra.mxu1 %v746_v19  ;;  %1047 = vmatmul.f32.gmra.mxu3 %v2655_v33 }
 0x171   : > { %1100 = vmatmul.f32.gmra.mxu2 %v752_v60 }
 0x177   : > { %974 = vmatmul.f32.gmra.mxu1 %v749_v36  ;;  %1050 = vmatmul.f32.gmra.mxu3 %v2669_v44 }
 0x17d   : > { %v916_v49 = vpop.f32.mrf.mxu0 }
 0x17f   : > { %977 = vmatmul.f32.gmra.mxu1 %v752_v60  ;;  %1053 = vmatmul.f32.gmra.mxu3 %v2686_v5 }
 0x183   : > { %v2776_v62 = vpop.f32.mrf.mxu2 }
 0x185   : > { %v919_v12 = vpop.f32.mrf.mxu0 }
 0x187   : > { %1056 = vmatmul.f32.gmra.mxu3 %v2701_v27  ;;  %1818 = vmatmul.msk.f32.vlgmr.msrb.gmra.mxu1 %vm874_vm13, %v2688_v8 }
 0x189   : > { %v2787_v47 = vpop.permute.xlu0 %861 }
 0x18b   : > { %v2781_v14 = vpop.f32.mrf.mxu2  ;;  %v2785_v57 = vpop.permute.xlu2 %866 }
 0x18d   : > { %v922_v25 = vpop.f32.mrf.mxu0 }
 0x18f   : > { %1059 = vmatmul.f32.gmra.mxu3 %v2722_v35  ;;  %1819 = vmatmul.msk.f32.gmra.mxu1 %vm874_vm13, %v2703_v28 }
 0x191   : > { %v2791_v55 = vpop.permute.xlu1 %871 }
 0x193   : > { %v2783_v26 = vpop.f32.mrf.mxu2  ;;  %v852_v1 = vpop.permute.xlu2 %851 }
 0x194   : > { %3345 = vst [vmem:[#allocation12_spill] sm:$0xff] %v2783_v26  ;;  %v837_v4 = vpop.permute.xlu0 %836 }
 0x195   : > { %v925_v33 = vpop.f32.mrf.mxu0  ;;  %v917_v5 = vadd.f32 %v916_v49, %v837_v4 }
 0x196   : > { %v926_v32 = vadd.f32 %v925_v33, %v852_v1 }
 0x199   : > { %v2797_v17 = vpop.permute.xlu1 %856 }
 0x19b   : > { %v1010_v34 = vpop.f32.mrf.mxu2  ;;  %v842_v18 = vpop.permute.xlu2 %841 }
 0x19c   : > { %v920_v20 = vadd.f32 %v919_v12, %v842_v18 }
 0x19d   : > { %v928_v44 = vpop.f32.mrf.mxu0 }
 0x19e   : > { %v929_v16 = vadd.f32 %v928_v44, %v2797_v17 }
 0x1a1   : > { %v847_v28 = vpop.permute.xlu1 %846 }
 0x1a2   : > { %v923_v10 = vadd.f32 %v922_v25, %v847_v28 }
 0x1a3   : > { %v1013_v45 = vpop.f32.mrf.mxu2 }
 0x1a5   : > { %v931_v46 = vpop.f32.mrf.mxu0 }
 0x1a6   : > { %v932_v52 = vadd.f32 %v931_v46, %v2787_v47 }
 0x1ab   : > { %v2789_v50 = vpop.f32.mrf.mxu2 }
 0x1ad   : > { %v934_v3 = vpop.f32.mrf.mxu0 }
 0x1ae   : > { %v935_v44 = vadd.f32 %v934_v3, %v2785_v57 }
 0x1b3   : > { %v2793_v58 = vpop.f32.mrf.mxu2 }
 0x1b5   : > { %v937_v53 = vpop.f32.mrf.mxu0 }
 0x1bb   : > { %v1080_v27 = vpop.f32.mrf.mxu2 }
 0x1be   : > { %v1121_v48 = vpop.f32.mrf.mxu0 }
 0x1c3   : > { %v1083_v13 = vpop.f32.mrf.mxu2 }
 0x1c4   : > { %v957_v8 = vpop.f32.mrf.mxu1 }
 0x1c5   : > { %v2795_v11 = vadd.f32 %v957_v8, %v917_v5 }
 0x1c6   : > { %v1124_v15 = vpop.f32.mrf.mxu0 }
 0x1cc   : > { %v960_v21 = vpop.f32.mrf.mxu1  ;;  %v1086_v39 = vpop.f32.mrf.mxu2 }
 0x1cd   : > { %v2799_v22 = vadd.f32 %v960_v21, %v920_v20 }
 0x1ce   : > { %v1127_v2 = vpop.f32.mrf.mxu0 }
 0x1d4   : > { %v963_v54 = vpop.f32.mrf.mxu1  ;;  %v1089_v56 = vpop.f32.mrf.mxu2 }
 0x1d5   : > { %v2801_v30 = vadd.f32 %v963_v54, %v923_v10 }
 0x1d6   : > { %v1130_v25 = vpop.f32.mrf.mxu0 }
 0x1da   : > { %v1039_v31 = vpop.f32.mrf.mxu3 }
 0x1db   : > { %v1040_v43 = vadd.f32 %v1039_v31, %v837_v4 }
 0x1dc   : > { %v966_v35 = vpop.f32.mrf.mxu1 }
 0x1dd   : > { %v2803_v63 = vadd.f32 %v966_v35, %v926_v32  ;;  %v1081_v37 = vadd.f32 %v1080_v27, %v1040_v43  ;;  %v1092_v27 = vpop.f32.mrf.mxu2 }
 0x1de   : > { %v1133_v54 = vpop.f32.mrf.mxu0 }
 0x1df   : > { %3346 = vst [vmem:[#allocation13_spill] sm:$0xff] %v2803_v63  ;;  %v2805_v38 = vadd.f32 %v1121_v48, %v1081_v37 }
 0x1e2   : > { %v1042_v29 = vpop.f32.mrf.mxu3 }
 0x1e3   : > { %v1043_v24 = vadd.f32 %v1042_v29, %v842_v18 }
 0x1e4   : > { %v969_v40 = vpop.f32.mrf.mxu1 }
 0x1e5   : > { %v970_v42 = vadd.f32 %v969_v40, %v929_v16  ;;  %v1084_v0 = vadd.f32 %v1083_v13, %v1043_v24  ;;  %v938_v13 = vadd.f32 %v937_v53, %v2791_v55  ;;  %v2851_v40 = vadd.f32 %v2776_v62, %v2799_v22 }
 0x1e7   : > { %v1011_v6 = vadd.f32 %v1010_v34, %v970_v42  ;;  %v2808_v7 = vadd.f32 %v1124_v15, %v1084_v0  ;;  %v2855_v42 = vadd.f32 %v2781_v14, %v2801_v30  ;;  %v1095_v0 = vpop.f32.mrf.mxu2 }
 0x1e9   : > { %v1153_v9 = vmul.f32 0.70710677, %v1011_v6 }
 0x1ea   : > { %v1045_v23 = vpop.f32.mrf.mxu3 }
 0x1eb   : > { %v1177_v41 = vand.u32 2147483647, %v1153_v9  ;;  %v1046_v51 = vadd.f32 %v1045_v23, %v847_v28  ;;  %vm1161_vm3 = vcmp.ge.f32.partialorder %v1153_v9, 0.0 }
 0x1ec   : > { %v972_v59 = vpop.f32.mrf.mxu1 }
 0x1ed   : > { %v973_v19 = vadd.f32 %v972_v59, %v932_v52  ;;  %v1087_v36 = vadd.f32 %v1086_v39, %v1046_v51  ;;  %v1185_v60 = vmul.f32 0.3275911, %v1177_v41  ;;  %v1393_v3 = vsub.f32 0.0, %v1177_v41 }
 0x1ef   : > { %v1014_v49 = vadd.f32 %v1013_v45, %v973_v19  ;;  %v2811_v12 = vadd.f32 %v1127_v2, %v1087_v36  ;;  %v2816_v4 = vadd.f32 1.0, %v1185_v60  ;;  %v1401_v35 = vmul.f32 %v1393_v3, %v1177_v41  ;;  %v1136_v36 = vpop.f32.mrf.mxu0 }
 0x1f0   : > { %v2859_v2 = vmul.f32 0.5, %v1011_v6 }
 0x1f1   : > { %v2813_v33 = vmul.f32 0.70710677, %v1014_v49  ;;  %1916 = vrcp.f32 %v2816_v4  ;;  %v1409_v9 = vmul.f32 1.442695, %v1401_v35  ;;  %v2873_v6 = vmul.f32 0.5, %v1014_v49 }
 0x1f2   : > { %v1048_v34 = vpop.f32.mrf.mxu3  ;;  %v1210_v51 = vand.u32 2147483647, %v2816_v4  ;;  %v1212_v60 = vand.u32 2147483648, %v2816_v4  ;;  %vm1206_vm4 = vweird.f32 %v2816_v4 }
 0x1f3   : > { %v1049_v5 = vadd.f32 %v1048_v34, %v852_v1  ;;  %v1179_v46 = vand.u32 2147483647, %v2813_v33  ;;  %vm1163_vm5 = vcmp.ge.f32.partialorder %v2813_v33, 0.0 }
 0x1f4   : > { %v975_v8 = vpop.f32.mrf.mxu1  ;;  %vm2958_vm15 = vcmp.eq.f32.partialorder %v1210_v51, 8.507059e+37 }
 0x1f5   : > { %v976_v18 = vadd.f32 %v975_v8, %v935_v44  ;;  %v1090_v20 = vadd.f32 %v1089_v56, %v1049_v5  ;;  %v1187_v21 = vmul.f32 0.3275911, %v1179_v46 }
 0x1f7   : > { %v2821_v45 = vadd.f32 %v2789_v50, %v976_v18  ;;  %v2823_v28 = vadd.f32 %v1130_v25, %v1090_v20  ;;  %v2825_v48 = vadd.f32 1.0, %v1187_v21  ;;  %v2834_v43 = vpop.eup %1916 }
 0x1f8   : > { %vm1207_vm10 = vweird.f32 %v2834_v43 }
 0x1f9   : > { %3347 = vst [vmem:[#allocation14_spill] sm:$0xff] %v2823_v28  ;;  %v2828_v10 = vmul.f32 0.70710677, %v2821_v45  ;;  %1918 = vrcp.f32 %v2825_v48  ;;  %vm1236_vm6 = vweird.f32 %v2825_v48  ;;  %vm2946_vm12 = vmor %vm1206_vm4, %vm1207_vm10 }
 0x1fa   : > { %v1051_v1 = vpop.f32.mrf.mxu3 }
 0x1fb   : > { %v1181_v31 = vand.u32 2147483647, %v2828_v10  ;;  %v1052_v32 = vadd.f32 %v1051_v1, %v2797_v17  ;;  %v2847_v17 = vadd.f32 %v2770_v61, %v2795_v11  ;;  %v3330_v61 = vmov -1.0  }
 0x1fc   : > { %v978_v50 = vpop.f32.mrf.mxu1  ;;  %v2865_v62 = vsel %vm1161_vm3, 1.0, %v3330_v61  ;;  %v1395_v11 = vsub.f32 0.0, %v1179_v46  ;;  %vm1165_vm8 = vcmp.ge.f32.partialorder %v2828_v10, 0.0 }
 0x1fd   : > { %v1189_v15 = vmul.f32 0.3275911, %v1181_v31  ;;  %v979_v37 = vadd.f32 %v978_v50, %v938_v13  ;;  %v1093_v29 = vadd.f32 %v1092_v27, %v1052_v32  ;;  %v1397_v34 = vsub.f32 0.0, %v1181_v31 }
 0x1fe   : > { %v1240_v32 = vand.u32 2147483647, %v2825_v48  ;;  %v2908_v50 = vsel %vm1163_vm5, 1.0, %v3330_v61 }
 0x1ff   : > { %v2836_v39 = vadd.f32 1.0, %v1189_v15  ;;  %v2839_v16 = vadd.f32 %v2793_v58, %v979_v37  ;;  %v2841_v24 = vadd.f32 %v1133_v54, %v1093_v29  ;;  %v2843_v53 = vpop.eup %1918  ;;  %v1202_v58 = vmul.f32 %v2834_v43, %v2816_v4  ;;  %v1098_v37 = vpop.f32.mrf.mxu2 }
 0x200   : > { %v1232_v23 = vmul.f32 %v2843_v53, %v2825_v48  ;;  %vm1237_vm7 = vweird.f32 %v2843_v53  ;;  %v1405_v1 = vmul.f32 %v1397_v34, %v1181_v31  ;;  %v2917_v29 = vor.u32 1.1754944e-38, %v1212_v60 }
 0x201   : > { %1920 = vrcp.f32 %v2836_v39  ;;  %v2868_v14 = vmul.f32 0.70710677, %v2839_v16  ;;  %v2871_v22 = vmul.f32 0.70710677, %v2841_v24  ;;  %v1203_v59 = vsub.f32 1.0, %v1202_v58  ;;  %vm2913_vm9 = vmor %vm1236_vm6, %vm1237_vm7 }
 0x202   : > { %v1054_v30 = vpop.f32.mrf.mxu3  ;;  %v1233_v52 = vsub.f32 1.0, %v1232_v23  ;;  %1922 = vpow2.f32 %v1409_v9  ;;  %v2926_v23 = vmul.f32 0.5, %v2821_v45  ;;  %vm1241_vm11 = vcmp.eq.f32.partialorder %v1240_v32, 8.507059e+37 }
 0x203   : > { %v1055_v41 = vadd.f32 %v1054_v30, %v2787_v47  ;;  %v2878_v56 = vand.u32 2147483647, %v2868_v14  ;;  %v1178_v19 = vand.u32 2147483647, %v2871_v22  ;;  %v1403_v47 = vmul.f32 %v1395_v11, %v1179_v46 }
 0x204   : > { %v1234_v25 = vmul.f32 %v2843_v53, %v1233_v52  ;;  %v1204_v21 = vmul.f32 %v2834_v43, %v1203_v59  ;;  %v1242_v46 = vand.u32 2147483648, %v2825_v48  ;;  %v1139_v48 = vpop.f32.mrf.mxu1  ;;  %v1417_v52 = vmul.f32 1.442695, %v1405_v1 }
 0x205   : > { %v1096_v49 = vadd.f32 %v1095_v0, %v1055_v41  ;;  %v1191_v44 = vmul.f32 0.3275911, %v2878_v56  ;;  %v1186_v5 = vmul.f32 0.3275911, %v1178_v19  ;;  %v1413_v35 = vmul.f32 1.442695, %v1403_v47 }
 0x206   : > { %v1235_v20 = vadd.f32 %v2843_v53, %v1234_v25  ;;  %v1394_v33 = vsub.f32 0.0, %v1178_v19  ;;  %v1243_v11 = vor.u32 1.1754944e-38, %v1242_v46  ;;  %v2929_v30 = vadd.f32 %v2834_v43, %v1204_v21 }
 0x207   : > { %v2886_v8 = vpop.eup %1920  ;;  %v2889_v18 = vadd.f32 %v1136_v36, %v1096_v49  ;;  %v2896_v3 = vadd.f32 1.0, %v1186_v5  ;;  %v2899_v54 = vadd.f32 1.0, %v1191_v44  ;;  %vm1266_vm14 = vweird.f32 %v2836_v39 }
 0x208   : > { %v1262_v27 = vmul.f32 %v2886_v8, %v2836_v39  ;;  %v2919_v58 = vpop.eup %1922  ;;  %v1239_v9 = vsel %vm2913_vm9, %v2843_v53, %v1235_v20  ;;  %v2937_v53 = vsel %vm1165_vm8, 1.0, %v3330_v61  ;;  %v1402_v60 = vmul.f32 %v1394_v33, %v1178_v19 }
 0x209   : > { %v2902_v13 = vmul.f32 0.70710677, %v2889_v18  ;;  %1924 = vrcp.f32 %v2896_v3  ;;  %v2940_v59 = vsel %vm1241_vm11, %v1243_v11, %v1239_v9  ;;  %v1225_v10 = vand.u32 2147483647, %v2896_v3 }
 0x20a   : > { %v1057_v15 = vpop.f32.mrf.mxu3  ;;  %v1263_v0 = vsub.f32 1.0, %v1262_v27  ;;  %1926 = vrcp.f32 %v2899_v54  ;;  %v1323_v34 = vmul.f32 1.0614054, %v2940_v59  ;;  %v1227_v20 = vand.u32 2147483648, %v2896_v3 }
 0x20b   : > { %v1180_v41 = vand.u32 2147483647, %v2902_v13  ;;  %1928 = vpow2.f32 %v1413_v35  ;;  %v1058_v45 = vadd.f32 %v1057_v15, %v2785_v57  ;;  %v1209_v57 = vsel %vm2946_vm12, %v2834_v43, %v2929_v30 }
 0x20c   : > { %v1264_v36 = vmul.f32 %v2886_v8, %v1263_v0  ;;  %1930 = vpow2.f32 %v1417_v52  ;;  %v1331_v43 = vadd.f32 -1.4531521, %v1323_v34  ;;  %v1270_v4 = vand.u32 2147483647, %v2836_v39  ;;  %v1101_v0 = vpop.f32.mrf.mxu2 }
 0x20d   : > { %v1188_v25 = vmul.f32 0.3275911, %v1180_v41  ;;  %v1099_v47 = vadd.f32 %v1098_v37, %v1058_v45  ;;  %v1411_v32 = vmul.f32 1.442695, %v1402_v60  ;;  %vm1267_vm0 = vweird.f32 %v2886_v8 }
 0x20e   : > { %v1265_v35 = vadd.f32 %v2886_v8, %v1264_v36  ;;  %vm1221_vm1 = vweird.f32 %v2896_v3  ;;  %vm2978_vm2 = vcmp.eq.f32.partialorder %v1225_v10, 8.507059e+37  ;;  %v1272_v33 = vand.u32 2147483648, %v2836_v39  ;;  %v1142_v36 = vpop.f32.mrf.mxu1  ;;  %vm2994_vm4 = vmor %vm1266_vm14, %vm1267_vm0 }
 0x20f   : > { %v1925_v44 = vpop.eup %1924  ;;  %v2964_v21 = vadd.f32 1.0, %v1188_v25  ;;  %v2967_v46 = vadd.f32 %v1139_v48, %v1099_v47  ;;  %v1228_v9 = vor.u32 1.1754944e-38, %v1227_v20  ;;  %v1396_v48 = vsub.f32 0.0, %v1180_v41 }
 0x210   : > { %v1217_v27 = vmul.f32 %v1925_v44, %v2896_v3  ;;  %v2970_v51 = vpop.eup %1926  ;;  %vm1222_vm3 = vweird.f32 %v1925_v44  ;;  %v1339_v60 = vmul.f32 %v1331_v43, %v2940_v59  ;;  %v1269_v10 = vsel %vm2994_vm4, %v2886_v8, %v1265_v35 }
 0x211   : > { %1932 = vrcp.f32 %v2964_v21  ;;  %v2975_v15 = vpop.eup %1928  ;;  %v2984_v11 = vmul.f32 0.70710677, %v2967_v46  ;;  %v1292_v52 = vmul.f32 %v2970_v51, %v2899_v54  ;;  %vm1271_vm5 = vcmp.eq.f32.partialorder %v1270_v4, 8.507059e+37  ;;  %vm1223_vm6 = vmor %vm1221_vm1, %vm1222_vm3 }
 0x212   : > { %v1060_v1 = vpop.f32.mrf.mxu3  ;;  %v1218_v37 = vsub.f32 1.0, %v1217_v27  ;;  %v2998_v34 = vpop.eup %1930  ;;  %1934 = vpow2.f32 %v1411_v32  ;;  %v1347_v20 = vadd.f32 1.4214138, %v1339_v60  ;;  %v1273_v27 = vor.u32 1.1754944e-38, %v1272_v33 }
 0x213   : > { %v1061_v30 = vadd.f32 %v1060_v1, %v2791_v55  ;;  %v1182_v55 = vand.u32 2147483647, %v2984_v11  ;;  %v1404_v39 = vmul.f32 %v1396_v48, %v1180_v41  ;;  %v3011_v32 = vsel %vm2958_vm15, %v2917_v29, %v1209_v57 }
 0x214   : > { %v1219_v45 = vmul.f32 %v1925_v44, %v1218_v37  ;;  %v3014_v35 = vsel %vm1271_vm5, %v1273_v27, %v1269_v10  ;;  %v1255_v3 = vand.u32 2147483647, %v2964_v21  ;;  %v1257_v41 = vand.u32 2147483648, %v2964_v21 }
 0x215   : > { %v1102_v49 = vadd.f32 %v1101_v0, %v1061_v30  ;;  %v1190_v43 = vmul.f32 0.3275911, %v1182_v55  ;;  %v1293_v0 = vsub.f32 1.0, %v1292_v52  ;;  %v1415_v52 = vmul.f32 1.442695, %v1404_v39 }
 0x216   : > { %v1220_v47 = vadd.f32 %v1925_v44, %v1219_v45  ;;  %v1398_v31 = vsub.f32 0.0, %v1182_v55  ;;  %v1321_v60 = vmul.f32 1.0614054, %v3011_v32  ;;  %vm1251_vm8 = vweird.f32 %v2964_v21 }
 0x217   : > { %v1933_v1 = vpop.eup %1932  ;;  %v3006_v37 = vadd.f32 %v1142_v36, %v1102_v49  ;;  %v3022_v33 = vadd.f32 1.0, %v1190_v43  ;;  %v1294_v25 = vmul.f32 %v2970_v51, %v1293_v0  ;;  %vm3036_vm9 = vcmp.eq.f32.partialorder %v1255_v3, 8.507059e+37 }
 0x218   : > { %v1224_v30 = vsel %vm1223_vm6, %v1925_v44, %v1220_v47  ;;  %v1247_v8 = vmul.f32 %v1933_v1, %v2964_v21  ;;  %v1355_v44 = vmul.f32 %v1347_v20, %v2940_v59  ;;  %v3029_v48 = vpop.eup %1934  ;;  %vm1252_vm7 = vweird.f32 %v1933_v1 }
 0x219   : > { %v3018_v4 = vsel %vm2978_vm2, %v1228_v9, %v1224_v30  ;;  %v3026_v57 = vmul.f32 0.70710677, %v3006_v37  ;;  %1936 = vrcp.f32 %v3022_v33  ;;  %v1325_v9 = vmul.f32 1.0614054, %v3014_v35  ;;  %vm1253_vm10 = vmor %vm1251_vm8, %vm1252_vm7 }
 0x21a   : > { %v1322_v19 = vmul.f32 1.0614054, %v3018_v4  ;;  %v1248_v29 = vsub.f32 1.0, %v1247_v8  ;;  %v1258_v27 = vor.u32 1.1754944e-38, %v1257_v41  ;;  %v1363_v39 = vadd.f32 -0.28449672, %v1355_v44 }
 0x21b   : > { %v3041_v10 = vand.u32 2147483647, %v3026_v57  ;;  %1938 = vpow2.f32 %v1415_v52  ;;  %v1406_v43 = vmul.f32 %v1398_v31, %v1182_v55  ;;  %v1333_v0 = vadd.f32 -1.4531521, %v1325_v9 }
 0x21c   : > { %v1330_v45 = vadd.f32 -1.4531521, %v1322_v19  ;;  %v1249_v36 = vmul.f32 %v1933_v1, %v1248_v29  ;;  %v1285_v3 = vand.u32 2147483647, %v3022_v33  ;;  %v1329_v19 = vadd.f32 -1.4531521, %v1321_v60 }
 0x21d   : > { %v1192_v30 = vmul.f32 0.3275911, %v3041_v10  ;;  %vm1296_vm11 = vweird.f32 %v2899_v54  ;;  %v1371_v44 = vmul.f32 %v1363_v39, %v2940_v59  ;;  %v3055_v55 = vadd.f32 %v2970_v51, %v1294_v25 }
 0x21e   : > { %v1338_v47 = vmul.f32 %v1330_v45, %v3018_v4  ;;  %v1250_v20 = vadd.f32 %v1933_v1, %v1249_v36  ;;  %v1341_v9 = vmul.f32 %v1333_v0, %v3014_v35  ;;  %vm1281_vm12 = vweird.f32 %v3022_v33 }
 0x21f   : > { %v1937_v29 = vpop.eup %1936  ;;  %v3051_v41 = vadd.f32 1.0, %v1192_v30  ;;  %v1287_v36 = vand.u32 2147483648, %v3022_v33  ;;  %v3063_v60 = vmul.f32 1.442695, %v1406_v43  ;;  %vm3066_vm14 = vcmp.eq.f32.partialorder %v1285_v3, 8.507059e+37 }
 0x220   : > { %v1346_v8 = vadd.f32 1.4214138, %v1338_v47  ;;  %v1254_v21 = vsel %vm1253_vm10, %v1933_v1, %v1250_v20  ;;  %v1277_v31 = vmul.f32 %v1937_v29, %v3022_v33  ;;  %v1337_v20 = vmul.f32 %v1329_v19, %v3011_v32 }
 0x221   : > { %v3049_v45 = vsel %vm3036_vm9, %v1258_v27, %v1254_v21  ;;  %1940 = vrcp.f32 %v3051_v41  ;;  %v3071_v27 = vpop.eup %1938  ;;  %vm1282_vm15 = vweird.f32 %v1937_v29  ;;  %v1315_v39 = vand.u32 2147483647, %v3051_v41 }
 0x222   : > { %v1354_v52 = vmul.f32 %v1346_v8, %v3018_v4  ;;  %v1324_v1 = vmul.f32 1.0614054, %v3049_v45  ;;  %v1278_v47 = vsub.f32 1.0, %v1277_v31  ;;  %v1317_v30 = vand.u32 2147483648, %v3051_v41  ;;  %vm1283_vm2 = vmor %vm1281_vm12, %vm1282_vm15 }
 0x223   : > { %v1379_v0 = vadd.f32 0.2548296, %v1371_v44  ;;  %v1288_v31 = vor.u32 1.1754944e-38, %v1287_v36  ;;  %v1345_v5 = vadd.f32 1.4214138, %v1337_v20  ;;  %vm1297_vm0 = vweird.f32 %v2970_v51 }
 0x224   : > { %v1332_v49 = vadd.f32 -1.4531521, %v1324_v1  ;;  %v1362_v43 = vadd.f32 -0.28449672, %v1354_v52  ;;  %v1279_v21 = vmul.f32 %v1937_v29, %v1278_v47  ;;  %v1349_v1 = vadd.f32 1.4214138, %v1341_v9  ;;  %vm3098_vm5 = vmor %vm1296_vm11, %vm1297_vm0 }
 0x225   : > { %v1387_v3 = vmul.f32 %v1379_v0, %v2940_v59  ;;  %v1400_v28 = vsub.f32 0.0, %v3041_v10  ;;  %vm1164_vm1 = vcmp.ge.f32.partialorder %v2902_v13, 0.0  ;;  %vm1311_vm3 = vweird.f32 %v3051_v41 }
 0x226   : > { %v1340_v8 = vmul.f32 %v1332_v49, %v3049_v45  ;;  %v1280_v61 = vadd.f32 %v1937_v29, %v1279_v21  ;;  %v1357_v26 = vmul.f32 %v1349_v1, %v3014_v35  ;;  %v1318_v44 = vor.u32 1.1754944e-38, %v1317_v30 }
 0x227   : > { %v1941_v63 = vpop.eup %1940  ;;  %v1427_v59 = vmul.f32 %v2975_v15, %v1387_v3  ;;  %v1353_v52 = vmul.f32 %v1345_v5, %v3011_v32  ;;  %v1370_v9 = vmul.f32 %v1362_v43, %v3018_v4  ;;  %vm3090_vm4 = vcmp.eq.f32.partialorder %v1315_v39, 8.507059e+37 }
 0x228   : > { %v1348_v19 = vadd.f32 1.4214138, %v1340_v8  ;;  %v1284_v49 = vsel %vm1283_vm2, %v1937_v29, %v1280_v61  ;;  %v1307_v47 = vmul.f32 %v1941_v63, %v3051_v41  ;;  %v1365_v61 = vadd.f32 -0.28449672, %v1357_v26 }
 0x229   : > { %v3104_v5 = vsel %vm3066_vm14, %v1288_v31, %v1284_v49  ;;  %v1435_v15 = vsub.f32 1.0, %v1427_v59  ;;  %v1299_v29 = vsel %vm3098_vm5, %v2970_v51, %v3055_v55  ;;  %v1302_v43 = vand.u32 2147483648, %v2899_v54 }
 0x22a   : > { %v1356_v36 = vmul.f32 %v1348_v19, %v3049_v45  ;;  %v1326_v30 = vmul.f32 1.0614054, %v3104_v5  ;;  %v1308_v0 = vsub.f32 1.0, %v1307_v47  ;;  %v1373_v21 = vmul.f32 %v1365_v61, %v3014_v35 }
 0x22b   : > { %v1443_v8 = vmul.f32 %v1435_v15, %v2908_v50  ;;  %v1361_v25 = vadd.f32 -0.28449672, %v1353_v52  ;;  %v1300_v1 = vand.u32 2147483647, %v2899_v54  ;;  %vm1312_vm6 = vweird.f32 %v1941_v63 }
 0x22c   : > { %v1364_v39 = vadd.f32 -0.28449672, %v1356_v36  ;;  %v1334_v31 = vadd.f32 -1.4531521, %v1326_v30  ;;  %v1309_v3 = vmul.f32 %v1941_v63, %v1308_v0  ;;  %v1378_v19 = vadd.f32 0.2548296, %v1370_v9  ;;  %vm1313_vm7 = vmor %vm1311_vm3, %vm1312_vm6 }
 0x22d   : > { %v1451_v51 = vadd.f32 1.0, %v1443_v8  ;;  %v1381_v55 = vadd.f32 0.2548296, %v1373_v21  ;;  %v1369_v59 = vmul.f32 %v1361_v25, %v3011_v32  ;;  %v1303_v50 = vor.u32 1.1754944e-38, %v1302_v43 }
 0x22e   : > { %v1372_v26 = vmul.f32 %v1364_v39, %v3049_v45  ;;  %v1342_v49 = vmul.f32 %v1334_v31, %v3104_v5  ;;  %v1310_v47 = vadd.f32 %v1941_v63, %v1309_v3  ;;  %vm1301_vm8 = vcmp.eq.f32.partialorder %v1300_v1, 8.507059e+37 }
 0x22f   : > { %v1459_v54 = vmul.f32 %v1451_v51, %v2873_v6  ;;  %v1389_v52 = vmul.f32 %v1381_v55, %v3014_v35  ;;  %v1377_v33 = vadd.f32 0.2548296, %v1369_v59  ;;  %v3123_v39 = vsel %vm1301_vm8, %v1303_v50, %v1299_v29 }
 0x230   : > { %v1380_v36 = vadd.f32 0.2548296, %v1372_v26  ;;  %v1350_v15 = vadd.f32 1.4214138, %v1342_v49  ;;  %v1314_v61 = vsel %vm1313_vm7, %v1941_v63, %v1310_v47  ;;  %v3366_v35 = vmov -1.0  }
 0x231   : > { %v3127_v30 = vsel %vm3090_vm4, %v1318_v44, %v1314_v61  ;;  %v3130_v0 = vmul.f32 %v1459_v54, %v2851_v40  ;;  %v1429_v41 = vmul.f32 %v2998_v34, %v1389_v52  ;;  %v1385_v6 = vmul.f32 %v1377_v33, %v3011_v32 }
 0x232   : > { %v1388_v9 = vmul.f32 %v1380_v36, %v3049_v45  ;;  %v1172_v43 = vsel %vm1164_vm1, 1.0, %v3366_v35  ;;  %v1358_v63 = vmul.f32 %v1350_v15, %v3104_v5  ;;  %v1328_v29 = vmul.f32 1.0614054, %v3127_v30 }
 0x233   : > { %1942 = vpow2.f32 %v3063_v60  ;;  %v1437_v44 = vsub.f32 1.0, %v1429_v41  ;;  %v1425_v40 = vmul.f32 %v2919_v58, %v1385_v6  ;;  %v1327_v20 = vmul.f32 1.0614054, %v3123_v39 }
 0x234   : > { %v1428_v45 = vmul.f32 %v3071_v27, %v1388_v9  ;;  %vm1162_vm9 = vcmp.ge.f32.partialorder %v2871_v22, 0.0  ;;  %v1386_v34 = vmul.f32 %v1378_v19, %v3018_v4  ;;  %v1366_v13 = vadd.f32 -0.28449672, %v1358_v63 }
 0x235   : > { %v1336_v8 = vadd.f32 -1.4531521, %v1328_v29  ;;  %v1408_v27 = vmul.f32 %v1400_v28, %v3041_v10  ;;  %v1445_v21 = vmul.f32 %v1437_v44, %v2937_v53  ;;  %v1433_v25 = vsub.f32 1.0, %v1425_v40 }
 0x236   : > { %v1436_v32 = vsub.f32 1.0, %v1428_v45  ;;  %v1335_v60 = vadd.f32 -1.4531521, %v1327_v20  ;;  %v3367_v58 = vsub.f32 0.0, %v2878_v56  ;;  %v1374_v31 = vmul.f32 %v1366_v13, %v3104_v5 }
 0x237   : > { %v1344_v4 = vmul.f32 %v1336_v8, %v3127_v30  ;;  %v1148_v3 = vmul.f32 0.5, %v2889_v18  ;;  %v1453_v19 = vadd.f32 1.0, %v1445_v21  ;;  %v1441_v51 = vmul.f32 %v1433_v25, %v2865_v62 }
 0x238   : > { %v1407_v1 = vmul.f32 %v3367_v58, %v2878_v56  ;;  %v1444_v26 = vmul.f32 %v1436_v32, %v1172_v43  ;;  %v1343_v28 = vmul.f32 %v1335_v60, %v3123_v39  ;;  %v1426_v53 = vmul.f32 %v3029_v48, %v1386_v34 }
 0x239   : > { %v1382_v55 = vadd.f32 0.2548296, %v1374_v31  ;;  %v1352_v59 = vadd.f32 1.4214138, %v1344_v4  ;;  %v1943_v36 = vpop.eup %1942  ;;  %v1423_v49 = vmul.f32 1.442695, %v1408_v27  ;;  %v1461_v56 = vmul.f32 %v1453_v19, %v2926_v23 }
 0x23a   : > { %v1452_v10 = vadd.f32 1.0, %v1444_v26  ;;  %v1449_v47 = vadd.f32 1.0, %v1441_v51  ;;  %v1351_v50 = vadd.f32 1.4214138, %v1343_v28  ;;  %v1421_v54 = vmul.f32 1.442695, %v1407_v1 }
 0x23b   : > { %v1390_v18 = vmul.f32 %v1382_v55, %v3104_v5  ;;  %v1360_v33 = vmul.f32 %v1352_v59, %v3127_v30  ;;  %vm1166_vm10 = vcmp.ge.f32.partialorder %v2984_v11, 0.0  ;;  %v3163_v62 = vmul.f32 %v1461_v56, %v2855_v42  ;;  %v3368_v28 = vld [vmem:[#allocation13_spill] sm:$0xff] }
 0x23c   : > { %v1460_v52 = vmul.f32 %v1452_v10, %v1148_v3  ;;  %v1457_v48 = vmul.f32 %v1449_v47, %v2859_v2  ;;  %v1359_v9 = vmul.f32 %v1351_v50, %v3123_v39  ;;  %v1434_v15 = vsub.f32 1.0, %v1426_v53  ;;  %v3369_v53 = vld [vmem:[#allocation12_spill] sm:$0xff] }
 0x23d   : > { %v1430_v61 = vmul.f32 %v1943_v36, %v1390_v18  ;;  %v1368_v23 = vadd.f32 -0.28449672, %v1360_v33  ;;  %1944 = vpow2.f32 %v1423_v49  ;;  %v1170_v45 = vsel %vm1162_vm9, 1.0, %v3366_v35 }
 0x23e   : > { %v3168_v41 = vmul.f32 %v1460_v52, %v2808_v7  ;;  %v3171_v5 = vmul.f32 %v1457_v48, %v2847_v17  ;;  %v1367_v6 = vadd.f32 -0.28449672, %v1359_v9  ;;  %1946 = vpow2.f32 %v1421_v54 }
 0x23f   : > { %v1438_v43 = vsub.f32 1.0, %v1430_v61  ;;  %v1376_v42 = vmul.f32 %v1368_v23, %v3127_v30  ;;  %v1174_v7 = vsel %vm1166_vm10, 1.0, %v3366_v35  ;;  %v1442_v17 = vmul.f32 %v1434_v15, %v1170_v45 }
 0x240   : > { %v1476_v2 = vadd.f32 %v3168_v41, %v3130_v0  ;;  %v1375_v63 = vmul.f32 %v1367_v6, %v3123_v39  ;;  %v1150_v20 = vmul.f32 0.5, %v2967_v46  ;;  %vm1168_vm11 = vcmp.ge.f32.partialorder %v3026_v57, 0.0 }
 0x241   : > { %v1446_v29 = vmul.f32 %v1438_v43, %v1174_v7  ;;  %v1384_v44 = vadd.f32 0.2548296, %v1376_v42  ;;  %v1450_v27 = vadd.f32 1.0, %v1442_v17  ;;  %vm1167_vm12 = vcmp.ge.f32.partialorder %v2868_v14, 0.0 }
 0x242   : > { %1477 = vadd.xlane.f32.xlu0 %v1476_v2  ;;  %v1383_v40 = vadd.f32 0.2548296, %v1375_v63  ;;  %v1146_v60 = vmul.f32 0.5, %v2841_v24  ;;  %v1176_v1 = vsel %vm1168_vm11, 1.0, %v3366_v35  ;;  %v1175_v26 = vsel %vm1167_vm12, 1.0, %v3366_v35  ;;  %v3370_v35 = vld [vmem:[#allocation14_spill] sm:$0xff] }
 0x243   : > { %v1454_v34 = vadd.f32 1.0, %v1446_v29  ;;  %v1392_v32 = vmul.f32 %v1384_v44, %v3127_v30  ;;  %v1945_v13 = vpop.eup %1944  ;;  %v1152_v57 = vmul.f32 0.5, %v3006_v37  ;;  %v1151_v14 = vmul.f32 0.5, %v2839_v16 }
 0x244   : > { %v1391_v22 = vmul.f32 %v1383_v40, %v3123_v39  ;;  %v1947_v8 = vpop.eup %1946  ;;  %v1458_v39 = vmul.f32 %v1450_v27, %v1146_v60  ;;  %v1008_v10 = vadd.f32 %v3369_v53, %v3368_v28  ;;  %v2114_v37 = vmov 256.0  }
 0x245   : > { %v1462_v21 = vmul.f32 %v1454_v34, %v1150_v20  ;;  %v1432_v11 = vmul.f32 %v1945_v13, %v1392_v32  ;;  %1948 = vrcp.f32 %v2114_v37 }
 0x246   : > { %v1431_v25 = vmul.f32 %v1947_v8, %v1391_v22  ;;  %v1585_v22 = vld [vmem:[%s3328_s5 + $0x8] sm:$0xff] }
 0x247   : > { %v1440_v58 = vsub.f32 1.0, %v1432_v11  ;;  %v1470_v46 = vmul.f32 %v1462_v21, %v2811_v12  ;;  %v1466_v12 = vmul.f32 %v1458_v39, %v2805_v38  ;;  %v1584_v11 = vld [vmem:[%s3328_s5] sm:$0xff] }
 0x248   : > { %v1439_v30 = vsub.f32 1.0, %v1431_v25  ;;  %v1586_v25 = vld [vmem:[%s3328_s5 + $0x10] sm:$0xff] }
 0x249   : > { %v1448_v31 = vmul.f32 %v1440_v58, %v1176_v1  ;;  %v1479_v4 = vadd.f32 %v1470_v46, %v3163_v62  ;;  %v1473_v49 = vadd.f32 %v1466_v12, %v3171_v5 }
 0x24a   : > { %v1447_v3 = vmul.f32 %v1439_v30, %v1175_v26 }
 0x24b   : > { %v1456_v19 = vadd.f32 1.0, %v1448_v31  ;;  %1480 = vadd.xlane.f32.xlu2 %v1479_v4  ;;  %v1949_v47 = vpop.eup %1948 }
 0x24c   : > { %v1455_v24 = vadd.f32 1.0, %v1447_v3  ;;  %v1486_v16 = vmul.f32 256.0, %v1949_v47  ;;  %vm1490_vm14 = vweird.f32 %v1949_v47 }
 0x24d   : > { %v1464_v51 = vmul.f32 %v1456_v19, %v1152_v57 }
 0x24e   : > { %v1463_v55 = vmul.f32 %v1455_v24, %v1151_v14  ;;  %v1487_v50 = vsub.f32 1.0, %v1486_v16 }
 0x24f   : > { %v1472_v59 = vmul.f32 %v1464_v51, %v3370_v35 }
 0x250   : > { %v1471_v36 = vmul.f32 %v1463_v55, %v1008_v10  ;;  %v1488_v54 = vmul.f32 %v1949_v47, %v1487_v50 }
 0x252   : > { %v1482_v56 = vadd.f32 %v1472_v59, %v1471_v36  ;;  %v1489_v52 = vadd.f32 %v1949_v47, %v1488_v54 }
 0x253   : > { %1474 = vadd.xlane.f32.xlu2 %v1473_v49 }
 0x254   : > { %1483 = vadd.xlane.f32.xlu1 %v1482_v56  ;;  %v1491_v38 = vsel %vm1490_vm14, %v1949_v47, %v1489_v52 }
 0x2b5   : > { %v1478_v18 = vpop.xlane.xlu0 %1477 }
 0x2b6   : > { %v1493_v33 = vmul.f32 %v1491_v38, %v1478_v18 }
 0x2b8   : > { %v3201_v48 = vsub.f32 %v3130_v0, %v1493_v33  ;;  %v3204_v9 = vsub.f32 %v3168_v41, %v1493_v33 }
 0x2ba   : > { %v1506_v15 = vmul.f32 %v3201_v48, %v3201_v48  ;;  %v1507_v61 = vmul.f32 %v3204_v9, %v3204_v9 }
 0x2bc   : > { %v1515_v23 = vadd.f32 %v1507_v61, %v1506_v15 }
 0x2be   : > { %1516 = vadd.xlane.f32.xlu0 %v1515_v23  ;;  %v1481_v6 = vpop.xlane.xlu2 %1480 }
 0x2bf   : > { %v1494_v43 = vmul.f32 %v1491_v38, %v1481_v6 }
 0x2c1   : > { %v3211_v42 = vsub.f32 %v3163_v62, %v1494_v43  ;;  %v3213_v2 = vsub.f32 %v1470_v46, %v1494_v43 }
 0x2c3   : > { %v1508_v0 = vmul.f32 %v3211_v42, %v3211_v42  ;;  %v1509_v41 = vmul.f32 %v3213_v2, %v3213_v2 }
 0x2c5   : > { %v1518_v45 = vadd.f32 %v1509_v41, %v1508_v0 }
 0x2c6   : > { %v1475_v63 = vpop.xlane.xlu2 %1474 }
 0x2c7   : > { %v1484_v7 = vpop.xlane.xlu1 %1483  ;;  %1519 = vadd.xlane.f32.xlu2 %v1518_v45  ;;  %v1492_v40 = vmul.f32 %v1491_v38, %v1475_v63 }
 0x2c8   : > { %v1495_v17 = vmul.f32 %v1491_v38, %v1484_v7 }
 0x2c9   : > { %v3228_v34 = vsub.f32 %v3171_v5, %v1492_v40  ;;  %v3230_v32 = vsub.f32 %v1466_v12, %v1492_v40  ;;  %v1587_v5 = vld [vmem:[%s3328_s5 + $0x18] sm:$0xff] }
 0x2ca   : > { %v3219_v29 = vsub.f32 %v1471_v36, %v1495_v17  ;;  %v3221_v44 = vsub.f32 %v1472_v59, %v1495_v17  ;;  %v1583_v40 = vld [vmem:[%s3327_s4 + $0x18] sm:$0xff] }
 0x2cb   : > { %v1504_v8 = vmul.f32 %v3228_v34, %v3228_v34  ;;  %v1505_v27 = vmul.f32 %v3230_v32, %v3230_v32 }
 0x2cc   : > { %v1510_v62 = vmul.f32 %v3219_v29, %v3219_v29  ;;  %v1511_v20 = vmul.f32 %v3221_v44, %v3221_v44 }
 0x2cd   : > { %v1512_v21 = vadd.f32 %v1505_v27, %v1504_v8 }
 0x2ce   : > { %v1521_v13 = vadd.f32 %v1511_v20, %v1510_v62 }
 0x2d0   : > { %1522 = vadd.xlane.f32.xlu1 %v1521_v13 }
 0x2d2   : > { %1595 = vperm.xlu0 %1915, %v1585_v22  }
 0x2d8   : > { %1513 = vadd.xlane.f32.xlu1 %v1512_v21 }
 0x2da   : > { %1605 = vperm.xlu0 %1915, %v1587_v5   ;;  %v1959_v5 = vld [vmem:[#allocation2 + $0x108] sm:$0xff] }
 0x2df   : > { %1590 = vperm.xlu2 %1914, %v1584_v11  }
 0x2f1   : > { %1600 = vperm.xlu1 %1913, %v1586_v25  }
 0x331   : > { %v1517_v60 = vpop.xlane.xlu0 %1516 }
 0x332   : > { %v1525_v58 = vmul.f32 %v1517_v60, %v1491_v38  ;;  %v1960_v60 = vld [vmem:[#allocation2 + $0x110] sm:$0xff] }
 0x334   : > { %v1529_v46 = vadd.f32 1e-05, %v1525_v58 }
 0x336   : > { %1950 = vrsqrt.f32 %v1529_v46  ;;  %vm1548_vm6 = vweird.f32 %v1529_v46 }
 0x33a   : > { %v1520_v1 = vpop.xlane.xlu2 %1519 }
 0x33b   : > { %v1526_v30 = vmul.f32 %v1520_v1, %v1491_v38 }
 0x33c   : > { %v1951_v31 = vpop.eup %1950 }
 0x33d   : > { %v1530_v26 = vadd.f32 1e-05, %v1526_v30  ;;  %v1543_v14 = vmul.f32 %v1951_v31, %v1529_v46  ;;  %vm1549_vm1 = vweird.f32 %v1951_v31 }
 0x33e   : > { %vm1550_vm7 = vmor %vm1548_vm6, %vm1549_vm1 }
 0x33f   : > { %1952 = vrsqrt.f32 %v1530_v26  ;;  %v1544_v51 = vmul.f32 %v1951_v31, %v1543_v14  ;;  %vm1558_vm2 = vweird.f32 %v1530_v26 }
 0x341   : > { %v1545_v35 = vmul.f32 0.5, %v1544_v51 }
 0x342   : > { %v1591_v62 = vpop.permute.xlu2 %1590 }
 0x343   : > { %v1523_v39 = vpop.xlane.xlu1 %1522  ;;  %v1546_v56 = vsub.f32 1.5, %v1545_v35 }
 0x344   : > { %v1527_v4 = vmul.f32 %v1523_v39, %v1491_v38  ;;  %v1596_v27 = vpop.permute.xlu0 %1595  ;;  %v1961_v39 = vld [vmem:[#allocation2 + $0x118] sm:$0xff] }
 0x345   : > { %v1953_v3 = vpop.eup %1952 }
 0x346   : > { %v1553_v57 = vmul.f32 %v1953_v3, %v1530_v26  ;;  %v1531_v19 = vadd.f32 1e-05, %v1527_v4  ;;  %vm1559_vm15 = vweird.f32 %v1953_v3 }
 0x347   : > { %vm1560_vm3 = vmor %vm1558_vm2, %vm1559_vm15 }
 0x348   : > { %1954 = vrsqrt.f32 %v1531_v19  ;;  %v1554_v24 = vmul.f32 %v1953_v3, %v1553_v57  ;;  %vm1568_vm4 = vweird.f32 %v1531_v19 }
 0x34a   : > { %v1555_v53 = vmul.f32 0.5, %v1554_v24 }
 0x34b   : > { %v1514_v12 = vpop.xlane.xlu1 %1513 }
 0x34c   : > { %v1524_v28 = vmul.f32 %v1514_v12, %v1491_v38  ;;  %v1556_v36 = vsub.f32 1.5, %v1555_v53  ;;  %v1547_v38 = vmul.f32 %v1951_v31, %v1546_v56  ;;  %v1606_v24 = vpop.permute.xlu0 %1605  ;;  %v1963_v12 = vld [vmem:[#allocation2 + $0x128] sm:$0xff] }
 0x34e   : > { %v1955_v10 = vpop.eup %1954  ;;  %v1528_v55 = vadd.f32 1e-05, %v1524_v28  ;;  %v1557_v16 = vmul.f32 %v1953_v3, %v1556_v36  ;;  %v1551_v43 = vsel %vm1550_vm7, %v1951_v31, %v1547_v38  ;;  %v1965_v36 = vld [vmem:[#allocation2 + $0x138] sm:$0xff] }
 0x34f   : > { %v1563_v59 = vmul.f32 %v1955_v10, %v1531_v19  ;;  %vm1569_vm0 = vweird.f32 %v1955_v10  ;;  %v1574_v7 = vmul.f32 %v1551_v43, %v3201_v48  ;;  %v1575_v63 = vmul.f32 %v1551_v43, %v3204_v9  ;;  %v1581_v48 = vld [vmem:[%s3327_s4 + $0x8] sm:$0xff]  ;;  %v1582_v9 = vld [vmem:[%s3327_s4 + $0x10] sm:$0xff] }
 0x350   : > { %1956 = vrsqrt.f32 %v1528_v55  ;;  %vm1570_vm5 = vmor %vm1568_vm4, %vm1569_vm0  ;;  %v1561_v15 = vsel %vm1560_vm3, %v1953_v3, %v1557_v16  ;;  %vm1538_vm9 = vweird.f32 %v1528_v55  ;;  %v1962_v3 = vld [vmem:[#allocation2 + $0x120] sm:$0xff] }
 0x351   : > { %v1564_v49 = vmul.f32 %v1955_v10, %v1563_v59  ;;  %v1576_v0 = vmul.f32 %v1561_v15, %v3211_v42  ;;  %v1577_v41 = vmul.f32 %v1561_v15, %v3213_v2  ;;  %v1580_v2 = vld [vmem:[%s3327_s4] sm:$0xff] }
 0x353   : > { %v1565_v37 = vmul.f32 0.5, %v1564_v49 }
 0x355   : > { %v1566_v47 = vsub.f32 1.5, %v1565_v37 }
 0x356   : > { %v1957_v50 = vpop.eup %1956 }
 0x357   : > { %v1567_v54 = vmul.f32 %v1955_v10, %v1566_v47  ;;  %v1533_v52 = vmul.f32 %v1957_v50, %v1528_v55  ;;  %vm1539_vm8 = vweird.f32 %v1957_v50 }
 0x358   : > { %vm1540_vm10 = vmor %vm1538_vm9, %vm1539_vm8 }
 0x359   : > { %v1534_v18 = vmul.f32 %v1957_v50, %v1533_v52  ;;  %v1571_v33 = vsel %vm1570_vm5, %v1955_v10, %v1567_v54  ;;  %v1964_v10 = vld [vmem:[#allocation2 + $0x130] sm:$0xff] }
 0x35a   : > { %v1578_v61 = vmul.f32 %v1571_v33, %v3219_v29  ;;  %v1579_v23 = vmul.f32 %v1571_v33, %v3221_v44 }
 0x35b   : > { %v1535_v6 = vmul.f32 0.5, %v1534_v18 }
 0x35c   : > { %1632 = vmatpush.msra.mxu1 %v1578_v61  ;;  %1661 = vmatpush.msrb.mxu3 %v1579_v23 }
 0x35d   : > { %v1536_v45 = vsub.f32 1.5, %v1535_v6 }
 0x35e   : > { %1633 = vmatpush.msra.mxu1 %v1576_v0  ;;  %1662 = vmatpush.msrb.mxu3 %v1577_v41 }
 0x35f   : > { %v1537_v17 = vmul.f32 %v1957_v50, %v1536_v45 }
 0x360   : > { %1634 = vmatpush.msra.mxu1 %v1574_v7  ;;  %1663 = vmatpush.msrb.mxu3 %v1575_v63 }
 0x361   : > { %v1541_v29 = vsel %vm1540_vm10, %v1957_v50, %v1537_v17 }
 0x362   : > { %v1572_v44 = vmul.f32 %v1541_v29, %v3228_v34  ;;  %v1573_v42 = vmul.f32 %v1541_v29, %v3230_v32  ;;  %v1958_v32 = vld [vmem:[#allocation2 + $0x100] sm:$0xff] }
 0x363   : > { %v1601_v30 = vpop.permute.xlu1 %1600 }
 0x364   : > { %1635 = vmatpush.msra.mxu1 %v1572_v44  ;;  %1664 = vmatpush.msrb.mxu3 %v1573_v42 }
 0x365   : > { %1820 = vmatmul.msk.f32.vlgmr.msra.gmra.mxu1 %vm874_vm13, %v1580_v2  ;;  %1824 = vmatmul.msk.f32.vlgmr.msrb.gmra.mxu3 %vm874_vm13, %v1580_v2 }
 0x36d   : > { %1821 = vmatmul.msk.f32.gmra.mxu1 %vm874_vm13, %v1581_v48  ;;  %1825 = vmatmul.msk.f32.gmra.mxu3 %vm874_vm13, %v1581_v48 }
 0x375   : > { %1822 = vmatmul.msk.f32.gmra.mxu1 %vm874_vm13, %v1582_v9  ;;  %1826 = vmatmul.msk.f32.gmra.mxu3 %vm874_vm13, %v1582_v9 }
 0x37d   : > { %1823 = vmatmul.msk.f32.gmra.mxu1 %vm874_vm13, %v1583_v40  ;;  %1827 = vmatmul.msk.f32.gmra.mxu3 %vm874_vm13, %v1583_v40 }
 0x3e2   : > { %v1637_v20 = vpop.f32.mrf.mxu1 }
 0x3e3   : > { %v1638_v34 = vadd.f32 %v1637_v20, %v1591_v62 }
 0x3e5   : > { %v1678_v13 = vadd.f32 %v1958_v32, %v1638_v34 }
 0x3e7   : > { %1686 = vst [vmem:[%s3278_s26] sm:$0xff] %v1678_v13 }
 0x3e8   : > { %v1666_v22 = vpop.f32.mrf.mxu3 }
 0x3e9   : > { %v1667_v8 = vadd.f32 %v1666_v22, %v1591_v62 }
 0x3ea   : > { %v1640_v21 = vpop.f32.mrf.mxu1 }
 0x3eb   : > { %v1679_v11 = vadd.f32 %v1959_v5, %v1667_v8  ;;  %v1641_v25 = vadd.f32 %v1640_v21, %v1596_v27 }
 0x3ed   : > { %1687 = vst [vmem:[%s3278_s26 + $0x8] sm:$0xff] %v1679_v11  ;;  %v1680_v58 = vadd.f32 %v1960_v60, %v1641_v25 }
 0x3ef   : > { %1688 = vst [vmem:[%s3278_s26 + $0x10] sm:$0xff] %v1680_v58 }
 0x3f0   : > { %v1669_v46 = vpop.f32.mrf.mxu3 }
 0x3f1   : > { %v1670_v1 = vadd.f32 %v1669_v46, %v1596_v27 }
 0x3f2   : > { %v1643_v26 = vpop.f32.mrf.mxu1 }
 0x3f3   : > { %v1681_v31 = vadd.f32 %v1961_v39, %v1670_v1  ;;  %v1644_v4 = vadd.f32 %v1643_v26, %v1601_v30 }
 0x3f5   : > { %1689 = vst [vmem:[%s3278_s26 + $0x18] sm:$0xff] %v1681_v31  ;;  %v1682_v57 = vadd.f32 %v1962_v3, %v1644_v4 }
 0x3f7   : > { %1690 = vst [vmem:[%s3278_s26 + $0x20] sm:$0xff] %v1682_v57 }
 0x3f8   : > { %v1672_v19 = vpop.f32.mrf.mxu3 }
 0x3f9   : > { %v1673_v14 = vadd.f32 %v1672_v19, %v1601_v30 }
 0x3fa   : > { %v1646_v51 = vpop.f32.mrf.mxu1 }
 0x3fb   : > { %v1683_v28 = vadd.f32 %v1963_v12, %v1673_v14  ;;  %v1647_v53 = vadd.f32 %v1646_v51, %v1606_v24 }
 0x3fd   : > { %1691 = vst [vmem:[%s3278_s26 + $0x28] sm:$0xff] %v1683_v28  ;;  %v1684_v55 = vadd.f32 %v1964_v10, %v1647_v53 }
 0x3ff   : > { %1692 = vst [vmem:[%s3278_s26 + $0x30] sm:$0xff] %v1684_v55 }
 0x400   : > { %v1675_v35 = vpop.f32.mrf.mxu3 }
 0x401   : > { %v1676_v59 = vadd.f32 %v1675_v35, %v1606_v24 }
 0x403   : > { %v1685_v49 = vadd.f32 %v1965_v36, %v1676_v59 }
 0x405   : > { %1693 = vst [vmem:[%s3278_s26 + $0x38] sm:$0xff] %v1685_v49 }
 0x406   : > { %2053 = shalt.err (!%p2050_p10)
}
 0x407   : > { %s2115_s19 = smov 256  }
 0x408   : > { %1845 = dma.vmem_to_hbm [thread:$0]  (%p2218_p7), %s1708_s9, 1024, %s1710_s15, %s1695_s25, %s2115_s19, %s2115_s19, %s2108_s13  }
 0x409 PF: > { %s1724_s26 = sand.u32 1, %s2084_s21   ;;  %p3371_p12 = scmp.ge.s32.totalorder %s2096_s24, 2 }
 0x40a   : > { %s1725_s29 = scalar_lea.sflag [#allocation5], %s1724_s26 }
 0x40b   : > { %p1856_p13 = pnand %p3371_p12, %p2186_p6 }
 0x40d   : > { %p1857_p0 = pneg %p1856_p13 }
 0x40f   : > { %2079 = dma.done.wait (%p1857_p0), %s1725_s29, 1024  }
 0x410   : > { %2081 = vsyncadd (%p1857_p0), %s1725_s29, 4294966272  ;;  %p20_p3 = scmp.ge.s32.totalorder %s2204_s11, 4   ;;  %s3372_s21 = smov %s2088_s22 }
 0x411   : > { %s3373_s22 = smov %s2092_s23  ;;  %s3374_s23 = smov %s2214_s16 }
 0x412   : > { %s3375_s24 = smov %s2204_s11  ;;  %22 = sbr.rel (!%p20_p3) target bundleno = 6 (0x6), region = 93 }
 0x417   :  { %1731 = vsyncpa [#allocation4], 1 }
 0x418   :  { %1733 = vsyncpa [#allocation4 + $0x1], 1 }
 0x419   :  { %1734 = vsyncpa [#allocation7], 1 }
 0x41a   :  { %1735 = vsyncpa [#allocation5], 1 }
 0x41b   :  { %1737 = vsyncpa [#allocation5 + $0x1], 1 }

</bundles_post_ra>
